<compile_context>
chip_gen: v7x
topology: tpu7x:2x2x1
jax: 0.10.0
libtpu: 0.0.40
codegen_flags: <defaults>
</compile_context>

<pallas_src>
import functools

import jax
import jax.numpy as jnp
from jax.experimental import pallas as pl
from jax.experimental.pallas import tpu as pltpu

_LANE = 128
_SUBLANE = 8


def _round_up(x, m):
    return ((x + m - 1) // m) * m


def _choose_tile_b(batch, max_tile_b):
    """Pick a batch tile: fill MXU rows, keep >=2 grid steps when possible
    (so v7x's second TensorCore isn't idle), minimize batch padding."""
    b8 = _round_up(batch, _SUBLANE)
    if b8 <= _SUBLANE:
        return _SUBLANE
    steps = max(2, -(-b8 // max_tile_b))
    return _round_up(-(-batch // steps), _SUBLANE)


def actor_kernel(x_ref, w1_ref, b1_ref, w2_ref, b2_ref, w3_ref, b3_ref, out_ref):
    # layer 1: Linear(state -> 800[pad 896]) + ReLU   (bias/ReLU in f32)
    h1 = jnp.dot(x_ref[...], w1_ref[...], preferred_element_type=jnp.float32)
    h1 = jnp.maximum(h1 + b1_ref[...], 0.0)
    # layer 2: Linear(800 -> 600[pad 640]) + ReLU; cast only the MXU input
    h2 = jnp.dot(h1.astype(w2_ref.dtype), w2_ref[...],
                 preferred_element_type=jnp.float32)
    h2 = jnp.maximum(h2 + b2_ref[...], 0.0)
    # layer 3: Linear(600 -> action[pad 128]) + tanh
    a = jnp.dot(h2.astype(w3_ref.dtype), w3_ref[...],
                preferred_element_type=jnp.float32)
    out_ref[...] = jnp.tanh(a + b3_ref[...]).astype(out_ref.dtype)


def prepare_actor_params(params, use_bf16=False):
    """Zero-pad weights/biases to 128-lane multiples ONCE (outside the per-call
    path) and optionally cast weights to bf16 for the MXU.  Exact numerics for
    the f32 path."""
    w1, b1 = params["w1"], params["b1"]
    w2, b2 = params["w2"], params["b2"]
    w3, b3 = params["w3"], params["b3"]
    state_dim, h1_dim = w1.shape
    h2_dim = w2.shape[1]
    action_dim = w3.shape[1]

    sp = _round_up(state_dim, _LANE)
    h1p = _round_up(h1_dim, _LANE)
    h2p = _round_up(h2_dim, _LANE)
    ap = _round_up(action_dim, _LANE)

    w_dtype = jnp.bfloat16 if use_bf16 else jnp.float32

    def pad2(a, rows, cols, dtype):
        a = jnp.pad(a, ((0, rows - a.shape[0]), (0, cols - a.shape[1])))
        return a.astype(dtype)

    padded = {
        "w1": pad2(w1, sp, h1p, w_dtype),
        "b1": pad2(b1, 1, h1p, jnp.float32),
        "w2": pad2(w2, h1p, h2p, w_dtype),
        "b2": pad2(b2, 1, h2p, jnp.float32),
        "w3": pad2(w3, h2p, ap, w_dtype),
        "b3": pad2(b3, 1, ap, jnp.float32),
    }
    meta = {"state_dim": state_dim, "action_dim": action_dim}
    return padded, meta


@functools.partial(jax.jit, static_argnames=("action_dim", "max_tile_b"))
def actor_forward(x, padded, *, action_dim, max_tile_b=256):
    """x: (batch, state_dim) f32.  padded: dict from prepare_actor_params."""
    w1, b1 = padded["w1"], padded["b1"]
    w2, b2 = padded["w2"], padded["b2"]
    w3, b3 = padded["w3"], padded["b3"]

    batch, state_dim = x.shape
    sp, h1p = w1.shape
    h2p = w2.shape[1]
    ap = w3.shape[1]

    tile_b = _choose_tile_b(batch, max_tile_b)
    b_pad = -(-batch // tile_b) * tile_b

    # Per-call activation padding (tiny): batch rows to a tile multiple, state
    # columns to the padded width.  Zero padding is exact.
    x_p = jnp.pad(x.astype(w1.dtype),
                  ((0, b_pad - batch), (0, sp - state_dim)))

    grid = (b_pad // tile_b,)

    itemsize = jnp.dtype(w1.dtype).itemsize
    cost = pl.CostEstimate(
        flops=2 * b_pad * (sp * h1p + h1p * h2p + h2p * ap),
        transcendentals=b_pad * ap,
        bytes_accessed=(
            itemsize * (b_pad * sp + sp * h1p + h1p * h2p + h2p * ap)
            + 4 * (h1p + h2p + ap + b_pad * ap)
        ),
    )

    out = pl.pallas_call(
        actor_kernel,
        out_shape=jax.ShapeDtypeStruct((b_pad, ap), jnp.float32),
        grid_spec=pltpu.PrefetchScalarGridSpec(
            num_scalar_prefetch=0,
            grid=grid,
            in_specs=[
                # activations: tiled over batch (lane-dense after padding)
                pl.BlockSpec((tile_b, sp), lambda i: (i, 0)),
                # weights / biases: full blocks, resident across the grid
                pl.BlockSpec((sp, h1p), lambda i: (0, 0)),
                pl.BlockSpec((1, h1p), lambda i: (0, 0)),
                pl.BlockSpec((h1p, h2p), lambda i: (0, 0)),
                pl.BlockSpec((1, h2p), lambda i: (0, 0)),
                pl.BlockSpec((h2p, ap), lambda i: (0, 0)),
                pl.BlockSpec((1, ap), lambda i: (0, 0)),
            ],
            out_specs=pl.BlockSpec((tile_b, ap), lambda i: (i, 0)),
        ),
        compiler_params=pltpu.CompilerParams(
            dimension_semantics=("parallel",),
        ),
        cost_estimate=cost,
    )(x_p, w1, b1, w2, b2, w3, b3)

    return out[:batch, :action_dim]


def init_actor_params(key, state_dim, action_dim):
    """Deterministic init mimicking PyTorch nn.Linear default:
    U(-1/sqrt(fan_in), 1/sqrt(fan_in)) for both weight and bias."""
    dims = [(state_dim, 800), (800, 600), (600, action_dim)]
    params = {}
    for idx, (fan_in, fan_out) in enumerate(dims, start=1):
        key, kw, kb = jax.random.split(key, 3)
        bound = 1.0 / jnp.sqrt(jnp.float32(fan_in))
        params[f"w{idx}"] = jax.random.uniform(
            kw, (fan_in, fan_out), jnp.float32, minval=-bound, maxval=bound
        )
        params[f"b{idx}"] = jax.random.uniform(
            kb, (1, fan_out), jnp.float32, minval=-bound, maxval=bound
        )
    return params


def actor_reference(x, params):
    h1 = jax.nn.relu(x @ params["w1"] + params["b1"])
    h2 = jax.nn.relu(h1 @ params["w2"] + params["b2"])
    return jnp.tanh(h2 @ params["w3"] + params["b3"])


if __name__ == "__main__":
    key = jax.random.PRNGKey(0)
    state_dim, action_dim = 24, 2

    key, kx = jax.random.split(key)
    params = init_actor_params(key, state_dim, action_dim)

    # f32 path: exact vs reference, at two batch sizes (grid=1 and grid=2).
    padded_f32, _ = prepare_actor_params(params, use_bf16=False)
    for batch in (2, 20):
        kx, kb = jax.random.split(kx)
        x = jax.random.normal(kb, (batch, state_dim), jnp.float32)
        out = jax.block_until_ready(
            actor_forward(x, padded_f32, action_dim=action_dim)
        )
        ref = actor_reference(x, params)
        assert out.shape == (batch, action_dim)
        assert jnp.allclose(out, ref, atol=1e-5, rtol=1e-5), "f32 mismatch vs ref"

    # Optional bf16 MXU fast path (v6e/v7x): bf16 only at the MXU inputs,
    # f32 accumulation and f32 elementwise; looser tolerance by design.
    padded_bf16, _ = prepare_actor_params(params, use_bf16=True)
    kx, kb = jax.random.split(kx)
    x = jax.random.normal(kb, (2, state_dim), jnp.float32)
    out_bf16 = jax.block_until_ready(
        actor_forward(x, padded_bf16, action_dim=action_dim)
    )
    ref = actor_reference(x, params)
    assert out_bf16.shape == (2, action_dim)
    assert jnp.allclose(out_bf16, ref, atol=3e-2, rtol=3e-2), "bf16 mismatch vs ref"

    print("KERNEL_OK")
</pallas_src>

<mosaic_0001>
module attributes {stable_mosaic.version = 11 : i64} {
  func.func @actor_kernel(%arg0: i32, %arg1: memref<8x128xf32, #tpu.memory_space<vmem>>, %arg2: memref<128x896xf32, #tpu.memory_space<vmem>>, %arg3: memref<1x896xf32, #tpu.memory_space<vmem>>, %arg4: memref<896x640xf32, #tpu.memory_space<vmem>>, %arg5: memref<1x640xf32, #tpu.memory_space<vmem>>, %arg6: memref<640x128xf32, #tpu.memory_space<vmem>>, %arg7: memref<1x128xf32, #tpu.memory_space<vmem>>, %arg8: memref<8x128xf32, #tpu.memory_space<vmem>>) attributes {dimension_semantics = [#tpu.dimension_semantics<parallel>], iteration_bounds = array<i64: 1>, scalar_prefetch = 0 : i64, scratch_operands = 0 : i64, tpu.core_type = #tpu.core_type<tc>, window_params = [{transform_indices = @transform_0, window_bounds = array<i64: 8, 128>}, {pipeline_mode = #tpu.pipeline_mode<synchronous>, transform_indices = @transform_1, window_bounds = array<i64: 128, 896>}, {pipeline_mode = #tpu.pipeline_mode<synchronous>, transform_indices = @transform_2, window_bounds = array<i64: 1, 896>}, {pipeline_mode = #tpu.pipeline_mode<synchronous>, transform_indices = @transform_3, window_bounds = array<i64: 896, 640>}, {pipeline_mode = #tpu.pipeline_mode<synchronous>, transform_indices = @transform_4, window_bounds = array<i64: 1, 640>}, {pipeline_mode = #tpu.pipeline_mode<synchronous>, transform_indices = @transform_5, window_bounds = array<i64: 640, 128>}, {pipeline_mode = #tpu.pipeline_mode<synchronous>, transform_indices = @transform_6, window_bounds = array<i64: 1, 128>}, {transform_indices = @transform_7, window_bounds = array<i64: 8, 128>}]} {
    %c0 = arith.constant 0 : index
    %c0_0 = arith.constant 0 : index
    %0 = vector.load %arg1[%c0, %c0_0] : memref<8x128xf32, #tpu.memory_space<vmem>>, vector<8x128xf32>
    %c0_1 = arith.constant 0 : index
    %c0_2 = arith.constant 0 : index
    %1 = vector.load %arg2[%c0_1, %c0_2] : memref<128x896xf32, #tpu.memory_space<vmem>>, vector<128x896xf32>
    %cst = arith.constant dense<0.000000e+00> : vector<8x896xf32>
    %2 = tpu.matmul %0, %1, %cst {dimension_numbers = #tpu.dot_dimension_numbers<[1], [0], [0], [1], [0, 0, 1, 1], [], []>} : vector<8x128xf32>, vector<128x896xf32>, vector<8x896xf32> -> vector<8x896xf32>
    %c0_3 = arith.constant 0 : index
    %c0_4 = arith.constant 0 : index
    %3 = vector.load %arg3[%c0_3, %c0_4] : memref<1x896xf32, #tpu.memory_space<vmem>>, vector<1x896xf32>
    %4 = vector.broadcast %3 : vector<1x896xf32> to vector<8x896xf32>
    %5 = arith.addf %2, %4 : vector<8x896xf32>
    %cst_5 = arith.constant 0.000000e+00 : f32
    %6 = vector.broadcast %cst_5 : f32 to vector<8x896xf32>
    %7 = arith.maximumf %5, %6 : vector<8x896xf32>
    %c0_6 = arith.constant 0 : index
    %c0_7 = arith.constant 0 : index
    %8 = vector.load %arg4[%c0_6, %c0_7] : memref<896x640xf32, #tpu.memory_space<vmem>>, vector<896x640xf32>
    %cst_8 = arith.constant dense<0.000000e+00> : vector<8x640xf32>
    %9 = tpu.matmul %7, %8, %cst_8 {dimension_numbers = #tpu.dot_dimension_numbers<[1], [0], [0], [1], [0, 0, 1, 1], [], []>} : vector<8x896xf32>, vector<896x640xf32>, vector<8x640xf32> -> vector<8x640xf32>
    %c0_9 = arith.constant 0 : index
    %c0_10 = arith.constant 0 : index
    %10 = vector.load %arg5[%c0_9, %c0_10] : memref<1x640xf32, #tpu.memory_space<vmem>>, vector<1x640xf32>
    %11 = vector.broadcast %10 : vector<1x640xf32> to vector<8x640xf32>
    %12 = arith.addf %9, %11 : vector<8x640xf32>
    %cst_11 = arith.constant 0.000000e+00 : f32
    %13 = vector.broadcast %cst_11 : f32 to vector<8x640xf32>
    %14 = arith.maximumf %12, %13 : vector<8x640xf32>
    %c0_12 = arith.constant 0 : index
    %c0_13 = arith.constant 0 : index
    %15 = vector.load %arg6[%c0_12, %c0_13] : memref<640x128xf32, #tpu.memory_space<vmem>>, vector<640x128xf32>
    %cst_14 = arith.constant dense<0.000000e+00> : vector<8x128xf32>
    %16 = tpu.matmul %14, %15, %cst_14 {dimension_numbers = #tpu.dot_dimension_numbers<[1], [0], [0], [1], [0, 0, 1, 1], [], []>} : vector<8x640xf32>, vector<640x128xf32>, vector<8x128xf32> -> vector<8x128xf32>
    %c0_15 = arith.constant 0 : index
    %c0_16 = arith.constant 0 : index
    %17 = vector.load %arg7[%c0_15, %c0_16] : memref<1x128xf32, #tpu.memory_space<vmem>>, vector<1x128xf32>
    %18 = vector.broadcast %17 : vector<1x128xf32> to vector<8x128xf32>
    %19 = arith.addf %16, %18 : vector<8x128xf32>
    %20 = math.tanh %19 : vector<8x128xf32>
    %c0_17 = arith.constant 0 : index
    %c0_18 = arith.constant 0 : index
    %21 = vector.load %arg8[%c0_17, %c0_18] : memref<8x128xf32, #tpu.memory_space<vmem>>, vector<8x128xf32>
    tpu.vector_store %arg8[%c0_17, %c0_18], %20 {strides = array<i32>} : memref<8x128xf32, #tpu.memory_space<vmem>>, vector<8x128xf32>,
    return
  }
  func.func @transform_0(%arg0: i32) -> (i32, i32) {
    %c0_i32 = arith.constant 0 : i32
    %c0_i32_0 = arith.constant 0 : i32
    return %arg0, %c0_i32 : i32, i32
  }
  func.func @transform_1(%arg0: i32) -> (i32, i32) {
    %c0_i32 = arith.constant 0 : i32
    %c0_i32_0 = arith.constant 0 : i32
    %c0_i32_1 = arith.constant 0 : i32
    return %c0_i32, %c0_i32_0 : i32, i32
  }
  func.func @transform_2(%arg0: i32) -> (i32, i32) {
    %c0_i32 = arith.constant 0 : i32
    %c0_i32_0 = arith.constant 0 : i32
    %c0_i32_1 = arith.constant 0 : i32
    return %c0_i32, %c0_i32_0 : i32, i32
  }
  func.func @transform_3(%arg0: i32) -> (i32, i32) {
    %c0_i32 = arith.constant 0 : i32
    %c0_i32_0 = arith.constant 0 : i32
    %c0_i32_1 = arith.constant 0 : i32
    return %c0_i32, %c0_i32_0 : i32, i32
  }
  func.func @transform_4(%arg0: i32) -> (i32, i32) {
    %c0_i32 = arith.constant 0 : i32
    %c0_i32_0 = arith.constant 0 : i32
    %c0_i32_1 = arith.constant 0 : i32
    return %c0_i32, %c0_i32_0 : i32, i32
  }
  func.func @transform_5(%arg0: i32) -> (i32, i32) {
    %c0_i32 = arith.constant 0 : i32
    %c0_i32_0 = arith.constant 0 : i32
    %c0_i32_1 = arith.constant 0 : i32
    return %c0_i32, %c0_i32_0 : i32, i32
  }
  func.func @transform_6(%arg0: i32) -> (i32, i32) {
    %c0_i32 = arith.constant 0 : i32
    %c0_i32_0 = arith.constant 0 : i32
    %c0_i32_1 = arith.constant 0 : i32
    return %c0_i32, %c0_i32_0 : i32, i32
  }
  func.func @transform_7(%arg0: i32) -> (i32, i32) {
    %c0_i32 = arith.constant 0 : i32
    %c0_i32_0 = arith.constant 0 : i32
    return %arg0, %c0_i32 : i32, i32
  }
}

</mosaic_0001>

<bundles_post_ra>
// kernel: actor_forward.1
= control target key start
LH: loop header
LB: loop body
LE: loop exit
PB: predicated region body
PF: predicated region fallthrough
CT: control target
= control target key end

     0   :  { %12 = vsyncpa [#allocation3], 0  ;;  %s3832_s0 = inlined_call_operand.vmem [shape: f32[8,128], index: 0, kind: input, shape index: {}]   ;;  %s3833_s1 = inlined_call_operand.hbm [shape: f32[128,896], index: 1, kind: input, shape index: {}]   ;;  %s3834_s2 = inlined_call_operand.hbm [shape: f32[1,896], index: 2, kind: input, shape index: {}]   ;;  %s3835_s3 = inlined_call_operand.hbm [shape: f32[896,640], index: 3, kind: input, shape index: {}]   ;;  %s3836_s4 = inlined_call_operand.hbm [shape: f32[1,640], index: 4, kind: input, shape index: {}]   ;;  %s3837_s5 = inlined_call_operand.hbm [shape: f32[640,128], index: 5, kind: input, shape index: {}]   ;;  %s3838_s6 = inlined_call_operand.hbm [shape: f32[1,128], index: 6, kind: input, shape index: {}]   ;;  %s3839_s7 = inlined_call_operand.vmem [shape: f32[8,128], index: 7, kind: output, shape index: {}]  }
   0x1   :  { %13 = vsyncpa [#allocation5], 0 }
   0x2   :  { %14 = vsyncpa [#allocation8], 0 }
   0x3   :  { %15 = vsyncpa [#allocation11], 0  ;;  %s3571_s24 = smov [#allocation4]   ;;  %s3572_s26 = smov [#allocation7]  }
   0x4   :  { %s36_s25 = sshll.u32 %s3571_s24, 4  ;;  %s58_s27 = sshll.u32 %s3572_s26, 4  ;;  %s37_s25 = int_to_ptr.vmem [resolvable:$true] %s36_s25  ;;  %s59_s27 = int_to_ptr.vmem [resolvable:$true] %s58_s27 }
   0x5   :  { %s3431_s30 = scalar_lea.hbm %s3834_s2, 112 }
   0x6   :  { %p3432_p0 = scmp.ne.s32.totalorder %s3834_s2, %s3431_s30  ;;  %p3435_p1 = scmp.lt.u32.totalorder %s3431_s30, %s3834_s2 }
   0x8   :  { %p3437_p2 = pnand %p3435_p1, %p3432_p0 }
   0xa   :  { %3440 = shalt.err (!%p3437_p2)
}
   0xb   :  { %s3441_s12 = scalar_lea.vmem %s37_s25, 112  ;;  %s3445_s13 = scalar_lea.vmem %s37_s25, 128 }
   0xc   :  { %p3442_p3 = scmp.ne.s32.totalorder %s37_s25, %s3441_s12  ;;  %p3446_p4 = scmp.lt.s32.totalorder %s37_s25, %s37_s25 }
   0xd   :  { %p3447_p5 = scmp.lt.s32.totalorder %s3445_s13, %s3441_s12 }
   0xf   :  { %p3448_p6 = por %p3447_p5, %p3446_p4 }
  0x11   :  { %p3449_p7 = pnand %p3448_p6, %p3442_p3 }
  0x13   :  { %3452 = shalt.err (!%p3449_p7)
}
  0x14   :  { %39 = dma.hbm_to_vmem [thread:$0]  %s3834_s2, 112, %s37_s25, [#allocation5]  }
  0x15   :  { %s3453_s18 = scalar_lea.hbm %s3836_s4, 80 }
  0x16   :  { %p3454_p8 = scmp.ne.s32.totalorder %s3836_s4, %s3453_s18  ;;  %p3457_p9 = scmp.lt.u32.totalorder %s3453_s18, %s3836_s4 }
  0x18   :  { %p3459_p10 = pnand %p3457_p9, %p3454_p8 }
  0x1a   :  { %3462 = shalt.err (!%p3459_p10)
}
  0x1b   :  { %s3463_s23 = scalar_lea.vmem %s59_s27, 80  ;;  %s3467_s24 = scalar_lea.vmem %s59_s27, 96 }
  0x1c   :  { %p3464_p11 = scmp.ne.s32.totalorder %s59_s27, %s3463_s23  ;;  %p3468_p12 = scmp.lt.s32.totalorder %s59_s27, %s59_s27 }
  0x1d   :  { %p3469_p13 = scmp.lt.s32.totalorder %s3467_s24, %s3463_s23 }
  0x1f   :  { %p3470_p0 = por %p3469_p13, %p3468_p12 }
  0x21   :  { %p3471_p1 = pnand %p3470_p0, %p3464_p11 }
  0x23   :  { %3474 = shalt.err (!%p3471_p1)
}
  0x24   :  { %61 = dma.hbm_to_vmem [thread:$0]  %s3836_s4, 80, %s59_s27, [#allocation8]  }
  0x25   :  { %s3573_s26 = smov [#allocation2]   ;;  %s3475_s8 = scalar_lea.hbm %s3833_s1, 14336 }
  0x26   :  { %s23_s28 = sshll.u32 %s3573_s26, 4  ;;  %p3476_p2 = scmp.ne.s32.totalorder %s3833_s1, %s3475_s8  ;;  %s24_s28 = int_to_ptr.vmem [resolvable:$true] %s23_s28 }
  0x27   :  { %p3479_p3 = scmp.lt.u32.totalorder %s3475_s8, %s3833_s1 }
  0x29   :  { %p3481_p4 = pnand %p3479_p3, %p3476_p2 }
  0x2b   :  { %3484 = shalt.err (!%p3481_p4)
}
  0x2c   :  { %s3485_s13 = scalar_lea.vmem %s24_s28, 14336  ;;  %p3490_p6 = scmp.lt.s32.totalorder %s24_s28, %s24_s28 }
  0x2d   :  { %p3486_p5 = scmp.ne.s32.totalorder %s24_s28, %s3485_s13  ;;  %p3491_p7 = scmp.lt.s32.totalorder %s3485_s13, %s3485_s13 }
  0x2f   :  { %p3492_p8 = por %p3491_p7, %p3490_p6 }
  0x31   :  { %p3493_p9 = pnand %p3492_p8, %p3486_p5 }
  0x33   :  { %3496 = shalt.err (!%p3493_p9)
}
  0x34   :  { %s3574_s4 = smov 896   ;;  %s3575_s27 = smov 56  }
  0x35   :  { %29 = dma.hbm_to_vmem [thread:$0]  %s3833_s1, 14336, %s24_s28, [#allocation3], %s3574_s4, %s3574_s4, %s3575_s27  }
  0x36   :  { %s3576_s16 = smov [#allocation6]   ;;  %s3497_s20 = scalar_lea.hbm %s3835_s3, 71680 }
  0x37   :  { %s45_s17 = sshll.u32 %s3576_s16, 4  ;;  %p3498_p10 = scmp.ne.s32.totalorder %s3835_s3, %s3497_s20  ;;  %s46_s17 = int_to_ptr.vmem [resolvable:$true] %s45_s17 }
  0x38   :  { %p3501_p11 = scmp.lt.u32.totalorder %s3497_s20, %s3835_s3 }
  0x3a   :  { %p3503_p12 = pnand %p3501_p11, %p3498_p10 }
  0x3c   :  { %3506 = shalt.err (!%p3503_p12)
}
  0x3d   :  { %s3507_s2 = scalar_lea.vmem %s46_s17, 71680  ;;  %p3512_p0 = scmp.lt.s32.totalorder %s46_s17, %s46_s17 }
  0x3e   :  { %p3508_p13 = scmp.ne.s32.totalorder %s46_s17, %s3507_s2  ;;  %p3513_p1 = scmp.lt.s32.totalorder %s3507_s2, %s3507_s2 }
  0x40   :  { %p3514_p2 = por %p3513_p1, %p3512_p0 }
  0x42   :  { %p3515_p3 = pnand %p3514_p2, %p3508_p13 }
  0x44   :  { %3518 = shalt.err (!%p3515_p3)
}
  0x45   :  { %s3577_s1 = smov 640   ;;  %s3578_s25 = smov 40  }
  0x46   :  { %51 = dma.hbm_to_vmem [thread:$0]  %s3835_s3, 71680, %s46_s17, [#allocation5], %s3577_s1, %s3577_s1, %s3578_s25  }
  0x47   :  { %s3579_s29 = smov [#allocation9]   ;;  %s3519_s10 = scalar_lea.hbm %s3837_s5, 10240 }
  0x48   :  { %s67_s30 = sshll.u32 %s3579_s29, 4  ;;  %p3520_p4 = scmp.ne.s32.totalorder %s3837_s5, %s3519_s10  ;;  %s68_s30 = int_to_ptr.vmem [resolvable:$true] %s67_s30 }
  0x49   :  { %p3523_p5 = scmp.lt.u32.totalorder %s3519_s10, %s3837_s5 }
  0x4b   :  { %p3525_p6 = pnand %p3523_p5, %p3520_p4 }
  0x4d   :  { %3528 = shalt.err (!%p3525_p6)
}
  0x4e   :  { %s3529_s27 = scalar_lea.vmem %s68_s30, 10240  ;;  %p3534_p8 = scmp.lt.s32.totalorder %s68_s30, %s68_s30 }
  0x4f   :  { %p3530_p7 = scmp.ne.s32.totalorder %s68_s30, %s3529_s27  ;;  %p3535_p9 = scmp.lt.s32.totalorder %s3529_s27, %s3529_s27 }
  0x51   :  { %p3536_p10 = por %p3535_p9, %p3534_p8 }
  0x53   :  { %p3537_p11 = pnand %p3536_p10, %p3530_p7 }
  0x55   :  { %3540 = shalt.err (!%p3537_p11)
}
  0x56   :  { %s3580_s3 = smov 128   ;;  %s3581_s14 = smov 8  }
  0x57   :  { %73 = dma.hbm_to_vmem [thread:$0]  %s3837_s5, 10240, %s68_s30, [#allocation8], %s3580_s3, %s3580_s3, %s3581_s14  }
  0x58   :  { %s3582_s17 = smov [#allocation10]   ;;  %s3541_s21 = scalar_lea.hbm %s3838_s6, 16 }
  0x59   :  { %s80_s18 = sshll.u32 %s3582_s17, 4  ;;  %p3542_p12 = scmp.ne.s32.totalorder %s3838_s6, %s3541_s21  ;;  %s81_s18 = int_to_ptr.vmem [resolvable:$true] %s80_s18 }
  0x5a   :  { %p3545_p13 = scmp.lt.u32.totalorder %s3541_s21, %s3838_s6 }
  0x5c   :  { %p3547_p0 = pnand %p3545_p13, %p3542_p12 }
  0x5e   :  { %3550 = shalt.err (!%p3547_p0)
}
  0x5f   :  { %s3551_s1 = scalar_lea.vmem %s81_s18, 16  ;;  %s3555_s5 = scalar_lea.vmem %s81_s18, 32 }
  0x60   :  { %p3552_p1 = scmp.ne.s32.totalorder %s81_s18, %s3551_s1  ;;  %p3556_p2 = scmp.lt.s32.totalorder %s81_s18, %s81_s18 }
  0x61   :  { %p3557_p3 = scmp.lt.s32.totalorder %s3555_s5, %s3551_s1 }
  0x63   :  { %p3558_p4 = por %p3557_p3, %p3556_p2 }
  0x65   :  { %p3559_p5 = pnand %p3558_p4, %p3552_p1 }
  0x67   :  { %3562 = shalt.err (!%p3559_p5)
}
  0x68   :  { %83 = dma.hbm_to_vmem [thread:$0]  %s3838_s6, 16, %s81_s18, [#allocation11]  }
  0x69   :  { %3563 = dma.done.wait [#allocation3], 14336  }
  0x6a   :  { %3564 = vsyncadd [#allocation3], 4294952960 }
  0x6b   :  { %3565 = dma.done.wait [#allocation5], 71792  }
  0x6c   :  { %3566 = vsyncadd [#allocation5], 4294895504 }
  0x6d   :  { %3567 = dma.done.wait [#allocation8], 10320  }
  0x6e   :  { %3568 = vsyncadd [#allocation8], 4294956976 }
  0x6f   :  { %3569 = dma.done.wait [#allocation11], 16  }
  0x70   :  { %3570 = vsyncadd [#allocation11], 4294967280  ;;  %v3583_v0 = vmov 0.0   ;;  %v104_v1 = vld [vmem:[#allocation2 + $0x8] sm:$0xff]  ;;  %v111_v2 = vld [vmem:[#allocation2 + $0x40] sm:$0xff]  ;;  %vm3585_vm0 = vmmov 0  }
  0x71   :  { %316 = vmatprep.mubr.f32.mxu0 %v3583_v0  ;;  %387 = vmatprep.mubr.f32.mxu1 %v3583_v0  ;;  %v103_v3 = vld [vmem:[#allocation2] sm:$0xff]  ;;  %v2621_v4 = vpack.c.bf16 %v111_v2, %v104_v1  ;;  %v110_v5 = vld [vmem:[#allocation2 + $0x38] sm:$0xff]  ;;  %v125_v7 = vld [vmem:[#allocation2 + $0xb0] sm:$0xff] }
  0x72   :  { %v118_v6 = vld [vmem:[#allocation2 + $0x78] sm:$0xff]  ;;  %v2623_v8 = vpack.c.bf16 %v110_v5, %v103_v3  ;;  %v117_v10 = vld [vmem:[#allocation2 + $0x70] sm:$0xff]  ;;  %v124_v11 = vld [vmem:[#allocation2 + $0xa8] sm:$0xff] }
  0x73   :  { %v2625_v9 = vpack.c.bf16 %v125_v7, %v118_v6  ;;  %v132_v12 = vld [vmem:[#allocation2 + $0xe8] sm:$0xff]  ;;  %2622 = vmatprep.subr.bf16.mxu0 %v2621_v4  ;;  %v139_v13 = vld [vmem:[#allocation2 + $0x120] sm:$0xff]  ;;  %v2627_v14 = vpack.c.bf16 %v124_v11, %v117_v10  ;;  %v138_v17 = vld [vmem:[#allocation2 + $0x118] sm:$0xff] }
  0x74   :  { %2624 = vmatpush1.bf16.msra.mxu0 %v2623_v8  ;;  %v2629_v15 = vpack.c.bf16 %v139_v13, %v132_v12  ;;  %v131_v16 = vld [vmem:[#allocation2 + $0xe0] sm:$0xff]  ;;  %v146_v18 = vld [vmem:[#allocation2 + $0x158] sm:$0xff]  ;;  %v153_v19 = vld [vmem:[#allocation2 + $0x190] sm:$0xff] }
  0x75   :  { %2626 = vmatprep.subr.bf16.mxu0 %v2625_v9  ;;  %v2631_v20 = vpack.c.bf16 %v138_v17, %v131_v16  ;;  %v2633_v21 = vpack.c.bf16 %v153_v19, %v146_v18  ;;  %v145_v22 = vld [vmem:[#allocation2 + $0x150] sm:$0xff]  ;;  %v152_v23 = vld [vmem:[#allocation2 + $0x188] sm:$0xff]  ;;  %v167_v25 = vld [vmem:[#allocation2 + $0x200] sm:$0xff] }
  0x76   :  { %v160_v24 = vld [vmem:[#allocation2 + $0x1c8] sm:$0xff]  ;;  %v159_v26 = vld [vmem:[#allocation2 + $0x1c0] sm:$0xff]  ;;  %v166_v27 = vld [vmem:[#allocation2 + $0x1f8] sm:$0xff]  ;;  %v2635_v31 = vpack.c.bf16 %v152_v23, %v145_v22 }
  0x77   :  { %v106_v28 = vld [vmem:[#allocation2 + $0x18] sm:$0xff]  ;;  %v113_v29 = vld [vmem:[#allocation2 + $0x50] sm:$0xff]  ;;  %v112_v33 = vld [vmem:[#allocation2 + $0x48] sm:$0xff]  ;;  %v2637_v36 = vpack.c.bf16 %v167_v25, %v160_v24  ;;  %v2639_v46 = vpack.c.bf16 %v166_v27, %v159_v26 }
  0x78   :  { %2628 = vmatpush1.bf16.msra.mxu0 %v2627_v14  ;;  %v105_v30 = vld [vmem:[#allocation2 + $0x10] sm:$0xff]  ;;  %v2653_v32 = vpack.c.bf16 %v113_v29, %v106_v28  ;;  %v120_v34 = vld [vmem:[#allocation2 + $0x88] sm:$0xff]  ;;  %v127_v35 = vld [vmem:[#allocation2 + $0xc0] sm:$0xff] }
  0x79   :  { %2630 = vmatprep.subr.bf16.mxu0 %v2629_v15  ;;  %v2655_v37 = vpack.c.bf16 %v112_v33, %v105_v30  ;;  %v2657_v38 = vpack.c.bf16 %v127_v35, %v120_v34  ;;  %v119_v39 = vld [vmem:[#allocation2 + $0x80] sm:$0xff]  ;;  %v126_v40 = vld [vmem:[#allocation2 + $0xb8] sm:$0xff]  ;;  %v181_v43 = vld [vmem:[#allocation2 + $0x270] sm:$0xff] }
  0x7a   :  { %v134_v41 = vld [vmem:[#allocation2 + $0xf8] sm:$0xff]  ;;  %2654 = vmatprep.subr.bf16.mxu1 %v2653_v32  ;;  %v141_v44 = vld [vmem:[#allocation2 + $0x130] sm:$0xff]  ;;  %v2659_v45 = vpack.c.bf16 %v126_v40, %v119_v39  ;;  %v140_v50 = vld [vmem:[#allocation2 + $0x128] sm:$0xff] }
  0x7b   :  { %v174_v42 = vld [vmem:[#allocation2 + $0x238] sm:$0xff]  ;;  %2656 = vmatpush1.bf16.msra.mxu1 %v2655_v37  ;;  %v173_v47 = vld [vmem:[#allocation2 + $0x230] sm:$0xff]  ;;  %v2661_v48 = vpack.c.bf16 %v141_v44, %v134_v41  ;;  %v180_v52 = vld [vmem:[#allocation2 + $0x268] sm:$0xff] }
  0x7c   :  { %2632 = vmatpush1.bf16.msra.mxu0 %v2631_v20  ;;  %2658 = vmatprep.subr.bf16.mxu1 %v2657_v38  ;;  %v133_v49 = vld [vmem:[#allocation2 + $0xf0] sm:$0xff]  ;;  %v2641_v51 = vpack.c.bf16 %v181_v43, %v174_v42  ;;  %v148_v53 = vld [vmem:[#allocation2 + $0x168] sm:$0xff]  ;;  %v155_v54 = vld [vmem:[#allocation2 + $0x1a0] sm:$0xff]  ;;  %v2643_v58 = vpack.c.bf16 %v180_v52, %v173_v47 }
  0x7d   :  { %2634 = vmatprep.subr.bf16.mxu0 %v2633_v21  ;;  %v188_v55 = vld [vmem:[#allocation2 + $0x2a8] sm:$0xff]  ;;  %v195_v56 = vld [vmem:[#allocation2 + $0x2e0] sm:$0xff]  ;;  %v2663_v57 = vpack.c.bf16 %v140_v50, %v133_v49  ;;  %v2665_v60 = vpack.c.bf16 %v155_v54, %v148_v53  ;;  %v154_v62 = vld [vmem:[#allocation2 + $0x198] sm:$0xff] }
  0x7e   :  { %v187_v59 = vld [vmem:[#allocation2 + $0x2a0] sm:$0xff]  ;;  %v2645_v63 = vpack.c.bf16 %v195_v56, %v188_v55  ;;  %v194_v1 = vld [vmem:[#allocation2 + $0x2d8] sm:$0xff]  ;;  %v169_v3 = vld [vmem:[#allocation2 + $0x210] sm:$0xff] }
  0x7f   :  { %2660 = vmatpush1.bf16.msra.mxu1 %v2659_v45  ;;  %v147_v61 = vld [vmem:[#allocation2 + $0x160] sm:$0xff]  ;;  %v162_v2 = vld [vmem:[#allocation2 + $0x1d8] sm:$0xff]  ;;  %v209_v5 = vld [vmem:[#allocation2 + $0x350] sm:$0xff]  ;;  %v2647_v7 = vpack.c.bf16 %v194_v1, %v187_v59  ;;  %v3584_v1 = vmov 0.0|0.0  }
  0x80   :  { %2636 = vmatpush1.bf16.msra.mxu0 %v2635_v31  ;;  %2662 = vmatprep.subr.bf16.mxu1 %v2661_v48  ;;  %v202_v4 = vld [vmem:[#allocation2 + $0x318] sm:$0xff]  ;;  %v2667_v6 = vpack.c.bf16 %v154_v62, %v147_v61  ;;  %v201_v8 = vld [vmem:[#allocation2 + $0x310] sm:$0xff]  ;;  %v2669_v9 = vpack.c.bf16 %v169_v3, %v162_v2  ;;  %v168_v11 = vld [vmem:[#allocation2 + $0x208] sm:$0xff] }
  0x81   :  { %2638 = vmatprep.subr.bf16.mxu0 %v2637_v36  ;;  %v161_v10 = vld [vmem:[#allocation2 + $0x1d0] sm:$0xff]  ;;  %v2649_v12 = vpack.c.bf16 %v209_v5, %v202_v4  ;;  %v208_v13 = vld [vmem:[#allocation2 + $0x348] sm:$0xff]  ;;  %v183_v15 = vld [vmem:[#allocation2 + $0x280] sm:$0xff] }
  0x82   :  { %v176_v14 = vld [vmem:[#allocation2 + $0x248] sm:$0xff]  ;;  %v115_v17 = vld [vmem:[#allocation2 + $0x60] sm:$0xff]  ;;  %v2671_v18 = vpack.c.bf16 %v168_v11, %v161_v10  ;;  %v2651_v19 = vpack.c.bf16 %v208_v13, %v201_v8  ;;  %v182_v22 = vld [vmem:[#allocation2 + $0x278] sm:$0xff] }
  0x83   :  { %2664 = vmatpush1.bf16.msra.mxu1 %v2663_v57  ;;  %v108_v16 = vld [vmem:[#allocation2 + $0x28] sm:$0xff]  ;;  %v2673_v20 = vpack.c.bf16 %v183_v15, %v176_v14  ;;  %v175_v21 = vld [vmem:[#allocation2 + $0x240] sm:$0xff]  ;;  %v190_v23 = vld [vmem:[#allocation2 + $0x2b8] sm:$0xff] }
  0x84   :  { %2640 = vmatpush1.bf16.msra.mxu0 %v2639_v46  ;;  %2666 = vmatprep.subr.bf16.mxu1 %v2665_v60  ;;  %v197_v24 = vld [vmem:[#allocation2 + $0x2f0] sm:$0xff]  ;;  %v2685_v25 = vpack.c.bf16 %v115_v17, %v108_v16  ;;  %v107_v26 = vld [vmem:[#allocation2 + $0x20] sm:$0xff]  ;;  %v114_v27 = vld [vmem:[#allocation2 + $0x58] sm:$0xff]  ;;  %v2675_v31 = vpack.c.bf16 %v182_v22, %v175_v21 }
  0x85   :  { %2642 = vmatprep.subr.bf16.mxu0 %v2641_v51  ;;  %v122_v28 = vld [vmem:[#allocation2 + $0x98] sm:$0xff]  ;;  %v129_v29 = vld [vmem:[#allocation2 + $0xd0] sm:$0xff]  ;;  %v3703_v30 = vld [vmem:[%s3832_s0] sm:$0xff]  ;;  %v2677_v32 = vpack.c.bf16 %v197_v24, %v190_v23  ;;  %v2687_v36 = vpack.c.bf16 %v114_v27, %v107_v26 }
  0x86   :  { %v189_v33 = vld [vmem:[#allocation2 + $0x2b0] sm:$0xff]  ;;  %v196_v34 = vld [vmem:[#allocation2 + $0x2e8] sm:$0xff]  ;;  %v211_v37 = vld [vmem:[#allocation2 + $0x360] sm:$0xff]  ;;  %v2689_v38 = vpack.c.bf16 %v129_v29, %v122_v28 }
  0x87   :  { %2668 = vmatpush1.bf16.msra.mxu1 %v2667_v6  ;;  %v204_v35 = vld [vmem:[#allocation2 + $0x328] sm:$0xff]  ;;  %v121_v39 = vld [vmem:[#allocation2 + $0x90] sm:$0xff]  ;;  %v143_v42 = vld [vmem:[#allocation2 + $0x140] sm:$0xff]  ;;  %v2679_v43 = vpack.c.bf16 %v196_v34, %v189_v33 }
  0x88   :  { %2644 = vmatpush1.bf16.msra.mxu0 %v2643_v58  ;;  %2670 = vmatprep.subr.bf16.mxu1 %v2669_v9  ;;  %v128_v40 = vld [vmem:[#allocation2 + $0xc8] sm:$0xff]  ;;  %v2681_v44 = vpack.c.bf16 %v211_v37, %v204_v35  ;;  %v203_v45 = vld [vmem:[#allocation2 + $0x320] sm:$0xff]  ;;  %v210_v46 = vld [vmem:[#allocation2 + $0x358] sm:$0xff] }
  0x89   :  { %2646 = vmatprep.subr.bf16.mxu0 %v2645_v63  ;;  %v136_v41 = vld [vmem:[#allocation2 + $0x108] sm:$0xff]  ;;  %v2691_v47 = vpack.c.bf16 %v128_v40, %v121_v39  ;;  %v135_v49 = vld [vmem:[#allocation2 + $0x100] sm:$0xff]  ;;  %v142_v50 = vld [vmem:[#allocation2 + $0x138] sm:$0xff]  ;;  %v2683_v53 = vpack.c.bf16 %v210_v46, %v203_v45 }
  0x8a   :  { %v2693_v48 = vpack.c.bf16 %v143_v42, %v136_v41  ;;  %v150_v51 = vld [vmem:[#allocation2 + $0x178] sm:$0xff]  ;;  %v157_v52 = vld [vmem:[#allocation2 + $0x1b0] sm:$0xff]  ;;  %v2695_v54 = vpack.c.bf16 %v142_v50, %v135_v49  ;;  %v116_v56 = vld [vmem:[#allocation2 + $0x68] sm:$0xff] }
  0x8b   :  { %2672 = vmatpush1.bf16.msra.mxu1 %v2671_v18  ;;  %v109_v55 = vld [vmem:[#allocation2 + $0x30] sm:$0xff]  ;;  %v2697_v57 = vpack.c.bf16 %v157_v52, %v150_v51  ;;  %v156_v59 = vld [vmem:[#allocation2 + $0x1a8] sm:$0xff]  ;;  %v171_v61 = vld [vmem:[#allocation2 + $0x220] sm:$0xff] }
  0x8c   :  { %2648 = vmatpush1.bf16.msra.mxu0 %v2647_v7  ;;  %2674 = vmatprep.subr.bf16.mxu1 %v2673_v20  ;;  %v149_v58 = vld [vmem:[#allocation2 + $0x170] sm:$0xff]  ;;  %v164_v60 = vld [vmem:[#allocation2 + $0x1e8] sm:$0xff]  ;;  %v2718_v62 = vpack.c.bf16 %v116_v56, %v109_v55  ;;  %v123_v2 = vld [vmem:[#allocation2 + $0xa0] sm:$0xff] }
  0x8d   :  { %2650 = vmatprep.subr.bf16.mxu0 %v2649_v12  ;;  %v2699_v63 = vpack.c.bf16 %v156_v59, %v149_v58  ;;  %v130_v3 = vld [vmem:[#allocation2 + $0xd8] sm:$0xff]  ;;  %v2701_v4 = vpack.c.bf16 %v171_v61, %v164_v60  ;;  %v163_v5 = vld [vmem:[#allocation2 + $0x1e0] sm:$0xff]  ;;  %v185_v8 = vld [vmem:[#allocation2 + $0x290] sm:$0xff] }
  0x8e   :  { %v170_v6 = vld [vmem:[#allocation2 + $0x218] sm:$0xff]  ;;  %v2721_v9 = vpack.c.bf16 %v130_v3, %v123_v2  ;;  %v137_v11 = vld [vmem:[#allocation2 + $0x110] sm:$0xff]  ;;  %v144_v12 = vld [vmem:[#allocation2 + $0x148] sm:$0xff] }
  0x8f   :  { %2676 = vmatpush1.bf16.msra.mxu1 %v2675_v31  ;;  %v178_v7 = vld [vmem:[#allocation2 + $0x258] sm:$0xff]  ;;  %v2703_v10 = vpack.c.bf16 %v170_v6, %v163_v5  ;;  %v177_v14 = vld [vmem:[#allocation2 + $0x250] sm:$0xff]  ;;  %v184_v15 = vld [vmem:[#allocation2 + $0x288] sm:$0xff]  ;;  %v2724_v18 = vpack.c.bf16 %v144_v12, %v137_v11 }
  0x90   :  { %2652 = vmatpush1.bf16.msra.mxu0 %v2651_v19  ;;  %2678 = vmatprep.subr.bf16.mxu1 %v2677_v32  ;;  %v2705_v13 = vpack.c.bf16 %v185_v8, %v178_v7  ;;  %v192_v16 = vld [vmem:[#allocation2 + $0x2c8] sm:$0xff]  ;;  %v199_v17 = vld [vmem:[#allocation2 + $0x300] sm:$0xff]  ;;  %v2707_v19 = vpack.c.bf16 %v184_v15, %v177_v14  ;;  %v158_v21 = vld [vmem:[#allocation2 + $0x1b8] sm:$0xff] }
  0x91   :  { %2686 = vmatprep.subr.bf16.mxu0 %v2685_v25  ;;  %v151_v20 = vld [vmem:[#allocation2 + $0x180] sm:$0xff]  ;;  %v2709_v22 = vpack.c.bf16 %v199_v17, %v192_v16  ;;  %v198_v24 = vld [vmem:[#allocation2 + $0x2f8] sm:$0xff]  ;;  %v213_v26 = vld [vmem:[#allocation2 + $0x370] sm:$0xff] }
  0x92   :  { %v191_v23 = vld [vmem:[#allocation2 + $0x2c0] sm:$0xff]  ;;  %v206_v25 = vld [vmem:[#allocation2 + $0x338] sm:$0xff]  ;;  %v2727_v27 = vpack.c.bf16 %v158_v21, %v151_v20  ;;  %v165_v29 = vld [vmem:[#allocation2 + $0x1f0] sm:$0xff] }
  0x93   :  { %317 = vmatmul.mubr.f32.vlgmr.msra.gmra.mrb[0].mxu0 %v3703_v30  ;;  %2680 = vmatpush1.bf16.msra.mxu1 %v2679_v43  ;;  %v2711_v28 = vpack.c.bf16 %v198_v24, %v191_v23  ;;  %v172_v31 = vld [vmem:[#allocation2 + $0x228] sm:$0xff]  ;;  %v2713_v32 = vpack.c.bf16 %v213_v26, %v206_v25  ;;  %v205_v33 = vld [vmem:[#allocation2 + $0x330] sm:$0xff]  ;;  %v179_v39 = vld [vmem:[#allocation2 + $0x260] sm:$0xff] }
  0x94   :  { %2688 = vmatpush1.bf16.msra.mxu0 %v2687_v36  ;;  %458 = vmatprep.mubr.f32.mxu0 %v3583_v0  ;;  %v212_v34 = vld [vmem:[#allocation2 + $0x368] sm:$0xff]  ;;  %v543_v35 = vld [vmem:[#allocation6 + $0x8] sm:$0xff]  ;;  %v548_v36 = vld [vmem:[#allocation6 + $0x30] sm:$0xff]  ;;  %v2730_v37 = vpack.c.bf16 %v172_v31, %v165_v29 }
  0x95   :  { %2690 = vmatprep.subr.bf16.mxu0 %v2689_v38  ;;  %2682 = vmatprep.subr.bf16.mxu1 %v2681_v44  ;;  %v2715_v38 = vpack.c.bf16 %v212_v34, %v205_v33  ;;  %v186_v40 = vld [vmem:[#allocation2 + $0x298] sm:$0xff]  ;;  %v2741_v41 = vpack.c.bf16 %v548_v36, %v543_v35  ;;  %v542_v42 = vld [vmem:[#allocation6] sm:$0xff]  ;;  %v547_v43 = vld [vmem:[#allocation6 + $0x28] sm:$0xff] }
  0x96   :  { %v553_v44 = vld [vmem:[#allocation6 + $0x58] sm:$0xff]  ;;  %v558_v45 = vld [vmem:[#allocation6 + $0x80] sm:$0xff]  ;;  %v2733_v46 = vpack.c.bf16 %v186_v40, %v179_v39  ;;  %v2743_v49 = vpack.c.bf16 %v547_v43, %v542_v42  ;;  %v552_v51 = vld [vmem:[#allocation6 + $0x50] sm:$0xff] }
  0x97   :  { %2684 = vmatpush1.bf16.msra.mxu1 %v2683_v53  ;;  %v2745_v50 = vpack.c.bf16 %v558_v45, %v553_v44  ;;  %v557_v52 = vld [vmem:[#allocation6 + $0x78] sm:$0xff]  ;;  %v563_v53 = vld [vmem:[#allocation6 + $0xa8] sm:$0xff]  ;;  %v550_v60 = vld [vmem:[#allocation6 + $0x40] sm:$0xff] }
  0x98   :  { %2692 = vmatpush1.bf16.msra.mxu0 %v2691_v47  ;;  %2717 = vmatprep.subr.bf16.mxu1 %v3584_v1  ;;  %v193_v47 = vld [vmem:[#allocation2 + $0x2d0] sm:$0xff]  ;;  %v207_v56 = vld [vmem:[#allocation2 + $0x340] sm:$0xff]  ;;  %v2747_v59 = vpack.c.bf16 %v557_v52, %v552_v51  ;;  %v578_v3 = vld [vmem:[#allocation6 + $0x120] sm:$0xff] }
  0x99   :  { %2694 = vmatprep.subr.bf16.mxu0 %v2693_v48  ;;  %v200_v48 = vld [vmem:[#allocation2 + $0x308] sm:$0xff]  ;;  %v545_v58 = vld [vmem:[#allocation6 + $0x18] sm:$0xff]  ;;  %v544_v6 = vld [vmem:[#allocation6 + $0x10] sm:$0xff] }
  0x9a   :  { %388 = vmatmul.mubr.f32.vlgmr.msra.gmra.mrb[0].mxu1 %v3703_v30  ;;  %v2736_v55 = vpack.c.bf16 %v200_v48, %v193_v47  ;;  %v573_v2 = vld [vmem:[#allocation6 + $0xf8] sm:$0xff]  ;;  %v2965_v5 = vpack.c.bf16 %v550_v60, %v545_v58  ;;  %v555_v8 = vld [vmem:[#allocation6 + $0x68] sm:$0xff]  ;;  %v572_v12 = vld [vmem:[#allocation6 + $0xf0] sm:$0xff] }
  0x9b   :  { %2719 = vmatpush3.bf16.msra.mxu1 %v2718_v62  ;;  %2548 = vmatprep.mubr.msk.f32.mxu1 %vm3585_vm0, %v3583_v0  ;;  %v562_v62 = vld [vmem:[#allocation6 + $0xa0] sm:$0xff]  ;;  %v549_v7 = vld [vmem:[#allocation6 + $0x38] sm:$0xff]  ;;  %v2753_v11 = vpack.c.bf16 %v578_v3, %v573_v2  ;;  %v583_v14 = vld [vmem:[#allocation6 + $0x148] sm:$0xff] }
  0x9c   :  { %2696 = vmatpush1.bf16.msra.mxu0 %v2695_v54  ;;  %2720 = vmatprep.subr.bf16.mxu1 %v3584_v1  ;;  %v568_v54 = vld [vmem:[#allocation6 + $0xd0] sm:$0xff]  ;;  %v2967_v16 = vpack.c.bf16 %v549_v7, %v544_v6  ;;  %v565_v20 = vld [vmem:[#allocation6 + $0xb8] sm:$0xff]  ;;  %v582_v24 = vld [vmem:[#allocation6 + $0x140] sm:$0xff] }
  0x9d   :  { %2698 = vmatprep.subr.bf16.mxu0 %v2697_v57  ;;  %v214_v57 = vld [vmem:[#allocation2 + $0x378] sm:$0xff]  ;;  %v2749_v61 = vpack.c.bf16 %v568_v54, %v563_v53  ;;  %v587_v25 = vld [vmem:[#allocation6 + $0x168] sm:$0xff]  ;;  %v593_v26 = vld [vmem:[#allocation6 + $0x198] sm:$0xff] }
  0x9e   :  { %v588_v15 = vld [vmem:[#allocation6 + $0x170] sm:$0xff]  ;;  %v575_v33 = vld [vmem:[#allocation6 + $0x108] sm:$0xff]  ;;  %v2759_v34 = vpack.c.bf16 %v587_v25, %v582_v24  ;;  %v574_v42 = vld [vmem:[#allocation6 + $0x100] sm:$0xff] }
  0x9f   :  { %2722 = vmatpush3.bf16.msra.mxu1 %v2721_v9  ;;  %v2757_v23 = vpack.c.bf16 %v588_v15, %v583_v14  ;;  %v564_v31 = vld [vmem:[#allocation6 + $0xb0] sm:$0xff]  ;;  %v603_v39 = vld [vmem:[#allocation6 + $0x1e8] sm:$0xff]  ;;  %v585_v44 = vld [vmem:[#allocation6 + $0x158] sm:$0xff] }
  0xa0   :  { %2700 = vmatpush1.bf16.msra.mxu0 %v2699_v63  ;;  %2723 = vmatprep.subr.bf16.mxu1 %v3584_v1  ;;  %v567_v63 = vld [vmem:[#allocation6 + $0xc8] sm:$0xff]  ;;  %v580_v35 = vld [vmem:[#allocation6 + $0x130] sm:$0xff]  ;;  %v602_v48 = vld [vmem:[#allocation6 + $0x1e0] sm:$0xff] }
  0xa1   :  { %2702 = vmatprep.subr.bf16.mxu0 %v2701_v4  ;;  %v2739_v4 = vpack.c.bf16 %v214_v57, %v207_v56  ;;  %v2751_v9 = vpack.c.bf16 %v567_v63, %v562_v62  ;;  %v608_v40 = vld [vmem:[#allocation6 + $0x210] sm:$0xff]  ;;  %v579_v43 = vld [vmem:[#allocation6 + $0x128] sm:$0xff]  ;;  %v618_v51 = vld [vmem:[#allocation6 + $0x260] sm:$0xff] }
  0xa2   :  { %v2765_v47 = vpack.c.bf16 %v608_v40, %v603_v39  ;;  %v2979_v52 = vpack.c.bf16 %v579_v43, %v574_v42  ;;  %v584_v54 = vld [vmem:[#allocation6 + $0x150] sm:$0xff]  ;;  %v595_v56 = vld [vmem:[#allocation6 + $0x1a8] sm:$0xff]  ;;  %v605_v6 = vld [vmem:[#allocation6 + $0x1f8] sm:$0xff] }
  0xa3   :  { %2725 = vmatpush3.bf16.msra.mxu1 %v2724_v18  ;;  %v554_v18 = vld [vmem:[#allocation6 + $0x60] sm:$0xff]  ;;  %v600_v58 = vld [vmem:[#allocation6 + $0x1d0] sm:$0xff]  ;;  %v623_v62 = vld [vmem:[#allocation6 + $0x288] sm:$0xff] }
  0xa4   :  { %2704 = vmatpush1.bf16.msra.mxu0 %v2703_v10  ;;  %2726 = vmatprep.subr.bf16.mxu1 %v3584_v1  ;;  %v560_v10 = vld [vmem:[#allocation6 + $0x90] sm:$0xff]  ;;  %v2985_v3 = vpack.c.bf16 %v600_v58, %v595_v56  ;;  %v643_v24 = vld [vmem:[#allocation6 + $0x328] sm:$0xff]  ;;  %v650_v56 = vld [vmem:[#allocation6 + $0x360] sm:$0xff] }
  0xa5   :  { %2706 = vmatprep.subr.bf16.mxu0 %v2705_v13  ;;  %v577_v13 = vld [vmem:[#allocation6 + $0x118] sm:$0xff]  ;;  %v2969_v17 = vpack.c.bf16 %v560_v10, %v555_v8  ;;  %v612_v60 = vld [vmem:[#allocation6 + $0x230] sm:$0xff]  ;;  %v610_v8 = vld [vmem:[#allocation6 + $0x220] sm:$0xff] }
  0xa6   :  { %v2755_v21 = vpack.c.bf16 %v577_v13, %v572_v12  ;;  %v628_v63 = vld [vmem:[#allocation6 + $0x2b0] sm:$0xff]  ;;  %v622_v10 = vld [vmem:[#allocation6 + $0x280] sm:$0xff]  ;;  %v633_v12 = vld [vmem:[#allocation6 + $0x2d8] sm:$0xff]  ;;  %v2989_v15 = vpack.c.bf16 %v610_v8, %v605_v6 }
  0xa7   :  { %2728 = vmatpush3.bf16.msra.mxu1 %v2727_v27  ;;  %v598_v27 = vld [vmem:[#allocation6 + $0x1c0] sm:$0xff]  ;;  %v648_v25 = vld [vmem:[#allocation6 + $0x350] sm:$0xff]  ;;  %v635_v42 = vld [vmem:[#allocation6 + $0x2e8] sm:$0xff] }
  0xa8   :  { %2708 = vmatpush1.bf16.msra.mxu0 %v2707_v19  ;;  %2729 = vmatprep.subr.bf16.mxu1 %v3584_v1  ;;  %v559_v19 = vld [vmem:[#allocation6 + $0x88] sm:$0xff]  ;;  %v2761_v36 = vpack.c.bf16 %v598_v27, %v593_v26  ;;  %v638_v13 = vld [vmem:[#allocation6 + $0x300] sm:$0xff]  ;;  %v660_v6 = vld [vmem:[#allocation6 + $0x3b0] sm:$0xff] }
  0xa9   :  { %2710 = vmatprep.subr.bf16.mxu0 %v2709_v22  ;;  %v570_v22 = vld [vmem:[#allocation6 + $0xe0] sm:$0xff]  ;;  %v672_v8 = vld [vmem:[#allocation6 + $0x410] sm:$0xff] }
  0xaa   :  { %v2973_v29 = vpack.c.bf16 %v570_v22, %v565_v20  ;;  %v620_v20 = vld [vmem:[#allocation6 + $0x270] sm:$0xff]  ;;  %v662_v58 = vld [vmem:[#allocation6 + $0x3c0] sm:$0xff] }
  0xab   :  { %2731 = vmatpush3.bf16.msra.mxu1 %v2730_v37  ;;  %v592_v37 = vld [vmem:[#allocation6 + $0x190] sm:$0xff] }
  0xac   :  { %2712 = vmatpush1.bf16.msra.mxu0 %v2711_v28  ;;  %2732 = vmatprep.subr.bf16.mxu1 %v3584_v1  ;;  %v2971_v28 = vpack.c.bf16 %v559_v19, %v554_v18  ;;  %v615_v18 = vld [vmem:[#allocation6 + $0x248] sm:$0xff]  ;;  %v632_v22 = vld [vmem:[#allocation6 + $0x2d0] sm:$0xff] }
  0xad   :  { %2714 = vmatprep.subr.bf16.mxu0 %v2713_v32  ;;  %v569_v32 = vld [vmem:[#allocation6 + $0xd8] sm:$0xff]  ;;  %v2993_v27 = vpack.c.bf16 %v620_v20, %v615_v18  ;;  %v670_v18 = vld [vmem:[#allocation6 + $0x400] sm:$0xff] }
  0xae   :  { %v682_v20 = vld [vmem:[#allocation6 + $0x460] sm:$0xff] }
  0xaf   :  { %2734 = vmatpush3.bf16.msra.mxu1 %v2733_v46  ;;  %v590_v46 = vld [vmem:[#allocation6 + $0x180] sm:$0xff] }
  0xb0   :  { %2716 = vmatpush1.bf16.msra.mxu0 %v2715_v38  ;;  %2735 = vmatprep.subr.bf16.mxu1 %v3584_v1  ;;  %v597_v38 = vld [vmem:[#allocation6 + $0x1b8] sm:$0xff]  ;;  %v2981_v53 = vpack.c.bf16 %v590_v46, %v585_v44  ;;  %v640_v44 = vld [vmem:[#allocation6 + $0x310] sm:$0xff] }
  0xb1   :  { %2742 = vmatprep.subr.bf16.mxu0 %v2741_v41  ;;  %v2977_v41 = vpack.c.bf16 %v580_v35, %v575_v33  ;;  %v2763_v45 = vpack.c.bf16 %v597_v38, %v592_v37  ;;  %v630_v33 = vld [vmem:[#allocation6 + $0x2c0] sm:$0xff]  ;;  %v653_v37 = vld [vmem:[#allocation6 + $0x378] sm:$0xff]  ;;  %v652_v46 = vld [vmem:[#allocation6 + $0x370] sm:$0xff] }
  0xb2   :  { %v642_v35 = vld [vmem:[#allocation6 + $0x320] sm:$0xff] }
  0xb3   :  { %459 = vmatmul.mubr.f32.vlgmr.msra.gmra.mrb[2].mxu0 %v3703_v30  ;;  %2737 = vmatpush3.bf16.msra.mxu1 %v2736_v55  ;;  %v589_v55 = vld [vmem:[#allocation6 + $0x178] sm:$0xff]  ;;  %v658_v38 = vld [vmem:[#allocation6 + $0x3a0] sm:$0xff] }
  0xb4   :  { %2744 = vmatpush1.bf16.msra.mxu0 %v2743_v49  ;;  %2738 = vmatprep.subr.bf16.mxu1 %v3584_v1  ;;  %v607_v49 = vld [vmem:[#allocation6 + $0x208] sm:$0xff]  ;;  %v2983_v2 = vpack.c.bf16 %v589_v55, %v584_v54  ;;  %v645_v54 = vld [vmem:[#allocation6 + $0x338] sm:$0xff] }
  0xb5   :  { %2746 = vmatprep.subr.bf16.mxu0 %v2745_v50  ;;  %v613_v50 = vld [vmem:[#allocation6 + $0x238] sm:$0xff]  ;;  %v2767_v57 = vpack.c.bf16 %v607_v49, %v602_v48  ;;  %v663_v48 = vld [vmem:[#allocation6 + $0x3c8] sm:$0xff]  ;;  %v668_v49 = vld [vmem:[#allocation6 + $0x3f0] sm:$0xff] }
  0xb7   :  { %2740 = vmatpush3.bf16.msra.mxu1 %v2739_v4  ;;  %v594_v4 = vld [vmem:[#allocation6 + $0x1a0] sm:$0xff] }
  0xb8   :  { %2748 = vmatpush1.bf16.msra.mxu0 %v2747_v59  ;;  %2966 = vmatprep.subr.bf16.mxu1 %v2965_v5  ;;  %v2769_v59 = vpack.c.bf16 %v618_v51, %v613_v50  ;;  %v599_v5 = vld [vmem:[#allocation6 + $0x1c8] sm:$0xff]  ;;  %v3001_v51 = vpack.c.bf16 %v640_v44, %v635_v42  ;;  %v690_v42 = vld [vmem:[#allocation6 + $0x4a0] sm:$0xff] }
  0xb9   :  { %2750 = vmatprep.subr.bf16.mxu0 %v2749_v61  ;;  %v617_v61 = vld [vmem:[#allocation6 + $0x258] sm:$0xff]  ;;  %v2987_v14 = vpack.c.bf16 %v599_v5, %v594_v4  ;;  %v655_v4 = vld [vmem:[#allocation6 + $0x388] sm:$0xff] }
  0xba   :  { %2549 = vmatmul.mubr.f32.vlgmr.msra.gmra.mrb[2].mxu1 %v3703_v30  ;;  %v2975_v30 = vpack.c.bf16 %v569_v32, %v564_v31  ;;  %v2771_v7 = vpack.c.bf16 %v617_v61, %v612_v60  ;;  %v625_v31 = vld [vmem:[#allocation6 + $0x298] sm:$0xff]  ;;  %v678_v61 = vld [vmem:[#allocation6 + $0x440] sm:$0xff] }
  0xbb   :  { %2968 = vmatpush1.bf16.msra.mxu1 %v2967_v16  ;;  %v604_v16 = vld [vmem:[#allocation6 + $0x1f0] sm:$0xff]  ;;  %v2997_v40 = vpack.c.bf16 %v630_v33, %v625_v31  ;;  %v673_v60 = vld [vmem:[#allocation6 + $0x418] sm:$0xff] }
  0xbc   :  { %2752 = vmatpush1.bf16.msra.mxu0 %v2751_v9  ;;  %2970 = vmatprep.subr.bf16.mxu1 %v2969_v17  ;;  %v2773_v9 = vpack.c.bf16 %v628_v63, %v623_v62  ;;  %v609_v17 = vld [vmem:[#allocation6 + $0x218] sm:$0xff]  ;;  %v3005_v63 = vpack.c.bf16 %v650_v56, %v645_v54  ;;  %v680_v31 = vld [vmem:[#allocation6 + $0x450] sm:$0xff] }
  0xbd   :  { %2754 = vmatprep.subr.bf16.mxu0 %v2753_v11  ;;  %v627_v11 = vld [vmem:[#allocation6 + $0x2a8] sm:$0xff]  ;;  %v2991_v26 = vpack.c.bf16 %v609_v17, %v604_v16  ;;  %v665_v16 = vld [vmem:[#allocation6 + $0x3d8] sm:$0xff]  ;;  %v692_v33 = vld [vmem:[#allocation6 + $0x4b0] sm:$0xff] }
  0xbe   :  { %v2775_v19 = vpack.c.bf16 %v627_v11, %v622_v10  ;;  %v683_v10 = vld [vmem:[#allocation6 + $0x468] sm:$0xff]  ;;  %v688_v11 = vld [vmem:[#allocation6 + $0x490] sm:$0xff]  ;;  %v705_v54 = vld [vmem:[#allocation6 + $0x518] sm:$0xff] }
  0xbf   :  { %2972 = vmatpush1.bf16.msra.mxu1 %v2971_v28  ;;  %v614_v28 = vld [vmem:[#allocation6 + $0x240] sm:$0xff] }
  0xc0   :  { %2756 = vmatpush1.bf16.msra.mxu0 %v2755_v21  ;;  %2974 = vmatprep.subr.bf16.mxu1 %v2973_v29  ;;  %v2777_v21 = vpack.c.bf16 %v638_v13, %v633_v12  ;;  %v619_v29 = vld [vmem:[#allocation6 + $0x268] sm:$0xff]  ;;  %v3009_v13 = vpack.c.bf16 %v660_v6, %v655_v4  ;;  %v702_v4 = vld [vmem:[#allocation6 + $0x500] sm:$0xff] }
  0xc1   :  { %2758 = vmatprep.subr.bf16.mxu0 %v2757_v23  ;;  %v637_v23 = vld [vmem:[#allocation6 + $0x2f8] sm:$0xff]  ;;  %v2995_v39 = vpack.c.bf16 %v619_v29, %v614_v28  ;;  %v675_v28 = vld [vmem:[#allocation6 + $0x428] sm:$0xff] }
  0xc2   :  { %v2779_v32 = vpack.c.bf16 %v637_v23, %v632_v22  ;;  %v693_v22 = vld [vmem:[#allocation6 + $0x4b8] sm:$0xff]  ;;  %v698_v23 = vld [vmem:[#allocation6 + $0x4e0] sm:$0xff] }
  0xc3   :  { %2976 = vmatpush1.bf16.msra.mxu1 %v2975_v30  ;;  %v624_v30 = vld [vmem:[#allocation6 + $0x290] sm:$0xff] }
  0xc4   :  { %2760 = vmatpush1.bf16.msra.mxu0 %v2759_v34  ;;  %2978 = vmatprep.subr.bf16.mxu1 %v2977_v41  ;;  %v2781_v34 = vpack.c.bf16 %v648_v25, %v643_v24  ;;  %v629_v41 = vld [vmem:[#allocation6 + $0x2b8] sm:$0xff]  ;;  %v3013_v25 = vpack.c.bf16 %v670_v18, %v665_v16  ;;  %v712_v18 = vld [vmem:[#allocation6 + $0x550] sm:$0xff] }
  0xc5   :  { %2762 = vmatprep.subr.bf16.mxu0 %v2761_v36  ;;  %v647_v36 = vld [vmem:[#allocation6 + $0x348] sm:$0xff]  ;;  %v2999_v50 = vpack.c.bf16 %v629_v41, %v624_v30  ;;  %v685_v41 = vld [vmem:[#allocation6 + $0x478] sm:$0xff] }
  0xc6   :  { %v2783_v43 = vpack.c.bf16 %v647_v36, %v642_v35  ;;  %v703_v35 = vld [vmem:[#allocation6 + $0x508] sm:$0xff]  ;;  %v708_v36 = vld [vmem:[#allocation6 + $0x530] sm:$0xff] }
  0xc7   :  { %2980 = vmatpush1.bf16.msra.mxu1 %v2979_v52  ;;  %v634_v52 = vld [vmem:[#allocation6 + $0x2e0] sm:$0xff] }
  0xc8   :  { %2764 = vmatpush1.bf16.msra.mxu0 %v2763_v45  ;;  %2982 = vmatprep.subr.bf16.mxu1 %v2981_v53  ;;  %v2785_v45 = vpack.c.bf16 %v658_v38, %v653_v37  ;;  %v639_v53 = vld [vmem:[#allocation6 + $0x308] sm:$0xff]  ;;  %v3017_v38 = vpack.c.bf16 %v680_v31, %v675_v28  ;;  %v725_v28 = vld [vmem:[#allocation6 + $0x5b8] sm:$0xff] }
  0xc9   :  { %2766 = vmatprep.subr.bf16.mxu0 %v2765_v47  ;;  %v657_v47 = vld [vmem:[#allocation6 + $0x398] sm:$0xff]  ;;  %v3003_v62 = vpack.c.bf16 %v639_v53, %v634_v52  ;;  %v694_v52 = vld [vmem:[#allocation6 + $0x4c0] sm:$0xff]  ;;  %v699_v53 = vld [vmem:[#allocation6 + $0x4e8] sm:$0xff] }
  0xca   :  { %v2787_v55 = vpack.c.bf16 %v657_v47, %v652_v46  ;;  %v684_v46 = vld [vmem:[#allocation6 + $0x470] sm:$0xff]  ;;  %v689_v47 = vld [vmem:[#allocation6 + $0x498] sm:$0xff]  ;;  %v3027_v56 = vpack.c.bf16 %v699_v53, %v694_v52  ;;  %v739_v52 = vld [vmem:[#allocation6 + $0x628] sm:$0xff] }
  0xcb   :  { %2984 = vmatpush1.bf16.msra.mxu1 %v2983_v2  ;;  %v644_v2 = vld [vmem:[#allocation6 + $0x330] sm:$0xff]  ;;  %v743_v53 = vld [vmem:[#allocation6 + $0x648] sm:$0xff] }
  0xcc   :  { %2768 = vmatpush1.bf16.msra.mxu0 %v2767_v57  ;;  %2986 = vmatprep.subr.bf16.mxu1 %v2985_v3  ;;  %v2789_v57 = vpack.c.bf16 %v668_v49, %v663_v48  ;;  %v649_v3 = vld [vmem:[#allocation6 + $0x358] sm:$0xff]  ;;  %v695_v48 = vld [vmem:[#allocation6 + $0x4c8] sm:$0xff]  ;;  %v700_v49 = vld [vmem:[#allocation6 + $0x4f0] sm:$0xff] }
  0xcd   :  { %2770 = vmatprep.subr.bf16.mxu0 %v2769_v59  ;;  %v667_v59 = vld [vmem:[#allocation6 + $0x3e8] sm:$0xff]  ;;  %v3007_v12 = vpack.c.bf16 %v649_v3, %v644_v2 }
  0xce   :  { %v2791_v5 = vpack.c.bf16 %v667_v59, %v662_v58  ;;  %v217_v58 = vlaneseq }
  0xcf   :  { %2988 = vmatpush1.bf16.msra.mxu1 %v2987_v14  ;;  %v654_v14 = vld [vmem:[#allocation6 + $0x380] sm:$0xff] }
  0xd0   :  { %2772 = vmatpush1.bf16.msra.mxu0 %v2771_v7  ;;  %2990 = vmatprep.subr.bf16.mxu1 %v2989_v15  ;;  %v2793_v7 = vpack.c.bf16 %v678_v61, %v673_v60  ;;  %v659_v15 = vld [vmem:[#allocation6 + $0x3a8] sm:$0xff]  ;;  %v3720_v59 = vshrl.u32 %v217_v58, 7  ;;  %v3723_v61 = vld [vmem:[#allocation4] sm:$0xff] }
  0xd1   :  { %2774 = vmatprep.subr.bf16.mxu0 %v2773_v9  ;;  %v677_v9 = vld [vmem:[#allocation6 + $0x438] sm:$0xff]  ;;  %v3011_v24 = vpack.c.bf16 %v659_v15, %v654_v14  ;;  %v720_v14 = vld [vmem:[#allocation6 + $0x590] sm:$0xff] }
  0xd2   :  { %v2795_v17 = vpack.c.bf16 %v677_v9, %v672_v8  ;;  %v219_v60 = vsub.s32 0, %v3720_v59  ;;  %v704_v8 = vld [vmem:[#allocation6 + $0x510] sm:$0xff]  ;;  %v709_v9 = vld [vmem:[#allocation6 + $0x538] sm:$0xff] }
  0xd3   :  { %2992 = vmatpush1.bf16.msra.mxu1 %v2991_v26  ;;  %v664_v26 = vld [vmem:[#allocation6 + $0x3d0] sm:$0xff] }
  0xd4   :  { %2776 = vmatpush1.bf16.msra.mxu0 %v2775_v19  ;;  %2994 = vmatprep.subr.bf16.mxu1 %v2993_v27  ;;  %v2797_v19 = vpack.c.bf16 %v688_v11, %v683_v10  ;;  %v669_v27 = vld [vmem:[#allocation6 + $0x3f8] sm:$0xff] }
  0xd5   :  { %2778 = vmatprep.subr.bf16.mxu0 %v2777_v21  ;;  %v687_v21 = vld [vmem:[#allocation6 + $0x488] sm:$0xff]  ;;  %v3015_v37 = vpack.c.bf16 %v669_v27, %v664_v26  ;;  %v713_v10 = vld [vmem:[#allocation6 + $0x558] sm:$0xff]  ;;  %v231_v26 = vsub.s32 3, %v3720_v59  ;;  %v728_v27 = vld [vmem:[#allocation6 + $0x5d0] sm:$0xff] }
  0xd6   :  { %v2799_v29 = vpack.c.bf16 %v687_v21, %v682_v20 }
  0xd7   :  { %2996 = vmatpush1.bf16.msra.mxu1 %v2995_v39  ;;  %v674_v39 = vld [vmem:[#allocation6 + $0x420] sm:$0xff] }
  0xd8   :  { %2780 = vmatpush1.bf16.msra.mxu0 %v2779_v32  ;;  %2998 = vmatprep.subr.bf16.mxu1 %v2997_v40  ;;  %v2801_v32 = vpack.c.bf16 %v698_v23, %v693_v22  ;;  %v679_v40 = vld [vmem:[#allocation6 + $0x448] sm:$0xff]  ;;  %v714_v23 = vld [vmem:[#allocation6 + $0x560] sm:$0xff] }
  0xd9   :  { %2782 = vmatprep.subr.bf16.mxu0 %v2781_v34  ;;  %v697_v34 = vld [vmem:[#allocation6 + $0x4d8] sm:$0xff]  ;;  %v3019_v44 = vpack.c.bf16 %v679_v40, %v674_v39  ;;  %v232_v40 = vrot.slane %v3723_v61, %v231_v26 }
  0xda   :  { %v2803_v30 = vpack.c.bf16 %v697_v34, %v692_v33  ;;  %v722_v33 = vld [vmem:[#allocation6 + $0x5a0] sm:$0xff]  ;;  %v727_v34 = vld [vmem:[#allocation6 + $0x5c8] sm:$0xff]  ;;  %v733_v39 = vld [vmem:[#allocation6 + $0x5f8] sm:$0xff] }
  0xdb   :  { %3000 = vmatpush1.bf16.msra.mxu1 %v2999_v50  ;;  %v3023_v50 = vpack.c.bf16 %v689_v47, %v684_v46  ;;  %v732_v46 = vld [vmem:[#allocation6 + $0x5f0] sm:$0xff]  ;;  %v737_v47 = vld [vmem:[#allocation6 + $0x618] sm:$0xff] }
  0xdc   :  { %2784 = vmatpush1.bf16.msra.mxu0 %v2783_v43  ;;  %3002 = vmatprep.subr.bf16.mxu1 %v3001_v51  ;;  %v2805_v43 = vpack.c.bf16 %v708_v36, %v703_v35  ;;  %v3025_v51 = vpack.c.bf16 %v700_v49, %v695_v48 }
  0xdd   :  { %2786 = vmatprep.subr.bf16.mxu0 %v2785_v45  ;;  %v3021_v45 = vpack.c.bf16 %v690_v42, %v685_v41  ;;  %v735_v41 = vld [vmem:[#allocation6 + $0x608] sm:$0xff]  ;;  %v740_v42 = vld [vmem:[#allocation6 + $0x630] sm:$0xff] }
  0xdf   :  { %3004 = vmatpush1.bf16.msra.mxu1 %v3003_v62  ;;  %v223_v62 = vsub.s32 1, %v3720_v59 }
  0xe0   :  { %2788 = vmatpush1.bf16.msra.mxu0 %v2787_v55  ;;  %3006 = vmatprep.subr.bf16.mxu1 %v3005_v63  ;;  %v710_v55 = vld [vmem:[#allocation6 + $0x540] sm:$0xff]  ;;  %v220_v63 = vrot.slane %v3723_v61, %v219_v60 }
  0xe1   :  { %2790 = vmatprep.subr.bf16.mxu0 %v2789_v57  ;;  %v3029_v57 = vpack.c.bf16 %v710_v55, %v705_v54  ;;  %v224_v2 = vrot.slane %v3723_v61, %v223_v62  ;;  %v748_v55 = vld [vmem:[#allocation6 + $0x670] sm:$0xff] }
  0xe3   :  { %3008 = vmatpush1.bf16.msra.mxu1 %v3007_v12  ;;  %v718_v12 = vld [vmem:[#allocation6 + $0x580] sm:$0xff] }
  0xe4   :  { %2792 = vmatpush1.bf16.msra.mxu0 %v2791_v5  ;;  %3010 = vmatprep.subr.bf16.mxu1 %v3009_v13  ;;  %v707_v5 = vld [vmem:[#allocation6 + $0x528] sm:$0xff]  ;;  %v2809_v21 = vpack.c.bf16 %v718_v12, %v713_v10  ;;  %v758_v10 = vld [vmem:[#allocation6 + $0x6c0] sm:$0xff]  ;;  %v760_v12 = vld [vmem:[#allocation6 + $0x6d0] sm:$0xff] }
  0xe5   :  { %2794 = vmatprep.subr.bf16.mxu0 %v2793_v7  ;;  %v715_v13 = vld [vmem:[#allocation6 + $0x568] sm:$0xff]  ;;  %v2807_v16 = vpack.c.bf16 %v707_v5, %v702_v4  ;;  %v2821_v5 = vpack.c.bf16 %v748_v55, %v743_v53  ;;  %v782_v55 = vld [vmem:[#allocation6 + $0x780] sm:$0xff] }
  0xe6   :  { %v3033_v22 = vpack.c.bf16 %v720_v14, %v715_v13  ;;  %v747_v4 = vld [vmem:[#allocation6 + $0x668] sm:$0xff] }
  0xe7   :  { %3012 = vmatpush1.bf16.msra.mxu1 %v3011_v24  ;;  %v719_v24 = vld [vmem:[#allocation6 + $0x588] sm:$0xff] }
  0xe8   :  { %2796 = vmatpush1.bf16.msra.mxu0 %v2795_v17  ;;  %3014 = vmatprep.subr.bf16.mxu1 %v3013_v25  ;;  %v3031_v17 = vpack.c.bf16 %v709_v9, %v704_v8  ;;  %v723_v25 = vld [vmem:[#allocation6 + $0x5a8] sm:$0xff]  ;;  %v749_v8 = vld [vmem:[#allocation6 + $0x678] sm:$0xff] }
  0xe9   :  { %2798 = vmatprep.subr.bf16.mxu0 %v2797_v19  ;;  %v717_v19 = vld [vmem:[#allocation6 + $0x578] sm:$0xff]  ;;  %v2813_v35 = vpack.c.bf16 %v728_v27, %v723_v25  ;;  %v770_v27 = vld [vmem:[#allocation6 + $0x720] sm:$0xff] }
  0xea   :  { %v2811_v31 = vpack.c.bf16 %v717_v19, %v712_v18  ;;  %v753_v9 = vld [vmem:[#allocation6 + $0x698] sm:$0xff] }
  0xeb   :  { %3016 = vmatpush1.bf16.msra.mxu1 %v3015_v37  ;;  %v724_v37 = vld [vmem:[#allocation6 + $0x5b0] sm:$0xff]  ;;  %v2825_v18 = vpack.c.bf16 %v758_v10, %v753_v9  ;;  %v765_v25 = vld [vmem:[#allocation6 + $0x6f8] sm:$0xff] }
  0xec   :  { %2800 = vmatpush1.bf16.msra.mxu0 %v2799_v29  ;;  %3018 = vmatprep.subr.bf16.mxu1 %v3017_v38  ;;  %v730_v29 = vld [vmem:[#allocation6 + $0x5e0] sm:$0xff]  ;;  %v729_v38 = vld [vmem:[#allocation6 + $0x5d8] sm:$0xff]  ;;  %v800_v9 = vld [vmem:[#allocation6 + $0x810] sm:$0xff] }
  0xed   :  { %2802 = vmatprep.subr.bf16.mxu0 %v2801_v32  ;;  %v3035_v32 = vpack.c.bf16 %v719_v24, %v714_v23  ;;  %v3037_v36 = vpack.c.bf16 %v730_v29, %v725_v28  ;;  %v763_v23 = vld [vmem:[#allocation6 + $0x6e8] sm:$0xff]  ;;  %v768_v24 = vld [vmem:[#allocation6 + $0x710] sm:$0xff] }
  0xef   :  { %3020 = vmatpush1.bf16.msra.mxu1 %v3019_v44  ;;  %v2815_v44 = vpack.c.bf16 %v727_v34, %v722_v33  ;;  %v2829_v33 = vpack.c.bf16 %v768_v24, %v763_v23  ;;  %v3053_v34 = vpack.c.bf16 %v770_v27, %v765_v25  ;;  %v810_v23 = vld [vmem:[#allocation6 + $0x860] sm:$0xff] }
  0xf0   :  { %2804 = vmatpush1.bf16.msra.mxu0 %v2803_v30  ;;  %3022 = vmatprep.subr.bf16.mxu1 %v3021_v45  ;;  %v738_v30 = vld [vmem:[#allocation6 + $0x620] sm:$0xff]  ;;  %v3039_v45 = vpack.c.bf16 %v729_v38, %v724_v37  ;;  %v773_v37 = vld [vmem:[#allocation6 + $0x738] sm:$0xff] }
  0xf1   :  { %2806 = vmatprep.subr.bf16.mxu0 %v2805_v43  ;;  %v2817_v49 = vpack.c.bf16 %v738_v30, %v733_v39  ;;  %v778_v38 = vld [vmem:[#allocation6 + $0x760] sm:$0xff]  ;;  %v775_v39 = vld [vmem:[#allocation6 + $0x748] sm:$0xff] }
  0xf2   :  { %v802_v27 = vld [vmem:[#allocation6 + $0x820] sm:$0xff] }
  0xf3   :  { %3024 = vmatpush1.bf16.msra.mxu1 %v3023_v50  ;;  %v3041_v50 = vpack.c.bf16 %v740_v42, %v735_v41  ;;  %v772_v42 = vld [vmem:[#allocation6 + $0x730] sm:$0xff] }
  0xf4   :  { %3026 = vmatprep.subr.bf16.mxu1 %v3025_v51  ;;  %v734_v51 = vld [vmem:[#allocation6 + $0x600] sm:$0xff] }
  0xf7   :  { %3028 = vmatpush1.bf16.msra.mxu1 %v3027_v56  ;;  %v745_v56 = vld [vmem:[#allocation6 + $0x658] sm:$0xff] }
  0xf8   :  { %3030 = vmatprep.subr.bf16.mxu1 %v3029_v57  ;;  %v750_v57 = vld [vmem:[#allocation6 + $0x680] sm:$0xff] }
 0x166   :  { %v318_v3 = vpop.f32.mrb[0].mxu0 }
 0x167   :  { %v319_v6 = vadd.f32 %v318_v3, %v220_v63  ;;  %v320_v7 = vpop.f32.mrb[1].mxu0  ;;  %v2819_v63 = vpack.c.bf16 %v737_v47, %v732_v46  ;;  %v742_v3 = vld [vmem:[#allocation6 + $0x640] sm:$0xff] }
 0x168   :  { %v321_v11 = vadd.f32 %v320_v7, %v224_v2  ;;  %v3043_v2 = vpack.c.bf16 %v739_v52, %v734_v51  ;;  %v744_v7 = vld [vmem:[#allocation6 + $0x650] sm:$0xff]  ;;  %v2823_v13 = vpack.c.bf16 %v747_v4, %v742_v3  ;;  %v774_v47 = vld [vmem:[#allocation6 + $0x740] sm:$0xff]  ;;  %v785_v51 = vld [vmem:[#allocation6 + $0x798] sm:$0xff] }
 0x169   :  { %v3734_v20 = vmax.f32 %v319_v6, 0.0  ;;  %v3045_v6 = vpack.c.bf16 %v750_v57, %v745_v56  ;;  %v3047_v14 = vpack.c.bf16 %v749_v8, %v744_v7  ;;  %v790_v52 = vld [vmem:[#allocation6 + $0x7c0] sm:$0xff]  ;;  %v787_v56 = vld [vmem:[#allocation6 + $0x7a8] sm:$0xff]  ;;  %v784_v3 = vld [vmem:[#allocation6 + $0x790] sm:$0xff] }
 0x16a   :  { %v3732_v15 = vmax.f32 %v321_v11, 0.0  ;;  %v755_v11 = vld [vmem:[#allocation6 + $0x6a8] sm:$0xff]  ;;  %v789_v4 = vld [vmem:[#allocation6 + $0x7b8] sm:$0xff]  ;;  %v798_v7 = vld [vmem:[#allocation6 + $0x800] sm:$0xff]  ;;  %v2839_v10 = vpack.c.bf16 %v787_v56, %v782_v55 }
 0x16b   :  { %v3049_v19 = vpack.c.bf16 %v760_v12, %v755_v11  ;;  %v795_v8 = vld [vmem:[#allocation6 + $0x7e8] sm:$0xff]  ;;  %v3063_v11 = vpack.c.bf16 %v789_v4, %v784_v3  ;;  %v792_v12 = vld [vmem:[#allocation6 + $0x7d0] sm:$0xff]  ;;  %v829_v3 = vld [vmem:[#allocation6 + $0x8f8] sm:$0xff] }
 0x16c   :  { %1193 = vmatprep.mubr.f32.mxu0 %v3732_v15  ;;  %1477 = vmatprep.mubr.f32.mxu1 %v3732_v15  ;;  %v827_v55 = vld [vmem:[#allocation6 + $0x8e8] sm:$0xff]  ;;  %v833_v4 = vld [vmem:[#allocation6 + $0x918] sm:$0xff] }
 0x16d   :  { %1194 = vmatmul.mubr.f32.vlgmr.msra.gmra.mrb[4].mxu0 %v3734_v20  ;;  %1478 = vmatmul.mubr.f32.vlgmr.msra.gmra.mrb[4].mxu1 %v3734_v20  ;;  %v3744_v43 = vpop.f32.mrb[0].mxu1 }
 0x16e   :  { %2808 = vmatpush1.bf16.msra.mxu0 %v2807_v16  ;;  %3032 = vmatpush1.bf16.msra.mxu1 %v3031_v17  ;;  %v391_v48 = vpop.f32.mrb[1].mxu1  ;;  %v752_v16 = vld [vmem:[#allocation6 + $0x690] sm:$0xff]  ;;  %v757_v17 = vld [vmem:[#allocation6 + $0x6b8] sm:$0xff] }
 0x16f   :  { %2810 = vmatprep.subr.bf16.mxu0 %v2809_v21  ;;  %3034 = vmatprep.subr.bf16.mxu1 %v3033_v22  ;;  %v392_v54 = vadd.f32 %v391_v48, %v232_v40  ;;  %v754_v21 = vld [vmem:[#allocation6 + $0x6a0] sm:$0xff]  ;;  %v759_v22 = vld [vmem:[#allocation6 + $0x6c8] sm:$0xff]  ;;  %v2827_v28 = vpack.c.bf16 %v757_v17, %v752_v16  ;;  %v780_v40 = vld [vmem:[#allocation6 + $0x770] sm:$0xff]  ;;  %v3065_v16 = vpack.c.bf16 %v800_v9, %v795_v8 }
 0x170   :  { %v3051_v29 = vpack.c.bf16 %v759_v22, %v754_v21  ;;  %v3057_v46 = vpack.c.bf16 %v780_v40, %v775_v39  ;;  %v779_v48 = vld [vmem:[#allocation6 + $0x768] sm:$0xff]  ;;  %v794_v17 = vld [vmem:[#allocation6 + $0x7e0] sm:$0xff]  ;;  %v808_v21 = vld [vmem:[#allocation6 + $0x850] sm:$0xff] }
 0x171   :  { %v3746_v58 = vmax.f32 %v392_v54, 0.0  ;;  %v3059_v54 = vpack.c.bf16 %v779_v48, %v774_v47  ;;  %v805_v22 = vld [vmem:[#allocation6 + $0x838] sm:$0xff]  ;;  %v819_v47 = vld [vmem:[#allocation6 + $0x8a8] sm:$0xff]  ;;  %v840_v8 = vld [vmem:[#allocation6 + $0x950] sm:$0xff] }
 0x172   :  { %2812 = vmatpush1.bf16.msra.mxu0 %v2811_v31  ;;  %3036 = vmatpush1.bf16.msra.mxu1 %v3035_v32  ;;  %v762_v31 = vld [vmem:[#allocation6 + $0x6e0] sm:$0xff]  ;;  %v767_v32 = vld [vmem:[#allocation6 + $0x708] sm:$0xff] }
 0x173   :  { %2814 = vmatprep.subr.bf16.mxu0 %v2813_v35  ;;  %3038 = vmatprep.subr.bf16.mxu1 %v3037_v36  ;;  %v764_v35 = vld [vmem:[#allocation6 + $0x6f0] sm:$0xff]  ;;  %v769_v36 = vld [vmem:[#allocation6 + $0x718] sm:$0xff]  ;;  %v2831_v30 = vpack.c.bf16 %v767_v32, %v762_v31  ;;  %v3069_v31 = vpack.c.bf16 %v810_v23, %v805_v22  ;;  %v823_v48 = vld [vmem:[#allocation6 + $0x8c8] sm:$0xff]  ;;  %v227_v23 = vsub.s32 2, %v3720_v59 }
 0x174   :  { %1264 = vmatprep.mubr.f32.mxu0 %v3746_v58  ;;  %1548 = vmatprep.mubr.f32.mxu1 %v3746_v58  ;;  %v3055_v41 = vpack.c.bf16 %v769_v36, %v764_v35  ;;  %v804_v32 = vld [vmem:[#allocation6 + $0x830] sm:$0xff]  ;;  %v818_v35 = vld [vmem:[#allocation6 + $0x8a0] sm:$0xff]  ;;  %v815_v36 = vld [vmem:[#allocation6 + $0x888] sm:$0xff] }
 0x175   :  { %v850_v22 = vld [vmem:[#allocation6 + $0x9a0] sm:$0xff] }
 0x176   :  { %2816 = vmatpush1.bf16.msra.mxu0 %v2815_v44  ;;  %3040 = vmatpush1.bf16.msra.mxu1 %v3039_v45  ;;  %v777_v44 = vld [vmem:[#allocation6 + $0x758] sm:$0xff]  ;;  %v2833_v45 = vpack.c.bf16 %v778_v38, %v773_v37  ;;  %v820_v37 = vld [vmem:[#allocation6 + $0x8b0] sm:$0xff] }
 0x177   :  { %2818 = vmatprep.subr.bf16.mxu0 %v2817_v49  ;;  %3042 = vmatprep.subr.bf16.mxu1 %v3041_v50  ;;  %v783_v49 = vld [vmem:[#allocation6 + $0x788] sm:$0xff]  ;;  %v788_v50 = vld [vmem:[#allocation6 + $0x7b0] sm:$0xff]  ;;  %v2835_v53 = vpack.c.bf16 %v777_v44, %v772_v42 }
 0x17a   :  { %2820 = vmatpush1.bf16.msra.mxu0 %v2819_v63  ;;  %3044 = vmatpush1.bf16.msra.mxu1 %v3043_v2  ;;  %v2837_v63 = vpack.c.bf16 %v788_v50, %v783_v49  ;;  %v3061_v2 = vpack.c.bf16 %v790_v52, %v785_v51  ;;  %v828_v49 = vld [vmem:[#allocation6 + $0x8f0] sm:$0xff]  ;;  %v825_v50 = vld [vmem:[#allocation6 + $0x8d8] sm:$0xff]  ;;  %v830_v51 = vld [vmem:[#allocation6 + $0x900] sm:$0xff] }
 0x17b   :  { %2822 = vmatprep.subr.bf16.mxu0 %v2821_v5  ;;  %3046 = vmatprep.subr.bf16.mxu1 %v3045_v6  ;;  %v793_v5 = vld [vmem:[#allocation6 + $0x7d8] sm:$0xff]  ;;  %v2853_v56 = vpack.c.bf16 %v828_v49, %v823_v48  ;;  %v859_v48 = vld [vmem:[#allocation6 + $0x9e8] sm:$0xff] }
 0x17c   :  { %v863_v49 = vld [vmem:[#allocation6 + $0xa08] sm:$0xff] }
 0x17e   :  { %2824 = vmatpush1.bf16.msra.mxu0 %v2823_v13  ;;  %3048 = vmatpush1.bf16.msra.mxu1 %v3047_v14  ;;  %v797_v13 = vld [vmem:[#allocation6 + $0x7f8] sm:$0xff]  ;;  %v2841_v14 = vpack.c.bf16 %v798_v7, %v793_v5  ;;  %v838_v5 = vld [vmem:[#allocation6 + $0x940] sm:$0xff]  ;;  %v835_v7 = vld [vmem:[#allocation6 + $0x928] sm:$0xff] }
 0x17f   :  { %2826 = vmatprep.subr.bf16.mxu0 %v2825_v18  ;;  %3050 = vmatprep.subr.bf16.mxu1 %v3049_v19  ;;  %v799_v18 = vld [vmem:[#allocation6 + $0x808] sm:$0xff]  ;;  %v2843_v24 = vpack.c.bf16 %v797_v13, %v792_v12  ;;  %v837_v12 = vld [vmem:[#allocation6 + $0x938] sm:$0xff]  ;;  %v2857_v13 = vpack.c.bf16 %v838_v5, %v833_v4  ;;  %v864_v5 = vld [vmem:[#allocation6 + $0xa10] sm:$0xff] }
 0x180   :  { %v803_v19 = vld [vmem:[#allocation6 + $0x828] sm:$0xff]  ;;  %v3067_v25 = vpack.c.bf16 %v799_v18, %v794_v17 }
 0x181   :  { %v839_v17 = vld [vmem:[#allocation6 + $0x948] sm:$0xff] }
 0x182   :  { %2828 = vmatpush1.bf16.msra.mxu0 %v2827_v28  ;;  %3052 = vmatpush1.bf16.msra.mxu1 %v3051_v29  ;;  %v807_v28 = vld [vmem:[#allocation6 + $0x848] sm:$0xff]  ;;  %v2845_v29 = vpack.c.bf16 %v808_v21, %v803_v19  ;;  %v848_v19 = vld [vmem:[#allocation6 + $0x990] sm:$0xff]  ;;  %v845_v21 = vld [vmem:[#allocation6 + $0x978] sm:$0xff] }
 0x183   :  { %2830 = vmatprep.subr.bf16.mxu0 %v2829_v33  ;;  %3054 = vmatprep.subr.bf16.mxu1 %v3053_v34  ;;  %v809_v33 = vld [vmem:[#allocation6 + $0x858] sm:$0xff]  ;;  %v2847_v39 = vpack.c.bf16 %v807_v28, %v802_v27  ;;  %v843_v18 = vld [vmem:[#allocation6 + $0x968] sm:$0xff]  ;;  %v842_v27 = vld [vmem:[#allocation6 + $0x960] sm:$0xff] }
 0x184   :  { %v813_v34 = vld [vmem:[#allocation6 + $0x878] sm:$0xff]  ;;  %v3071_v40 = vpack.c.bf16 %v809_v33, %v804_v32  ;;  %v847_v28 = vld [vmem:[#allocation6 + $0x988] sm:$0xff]  ;;  %v844_v32 = vld [vmem:[#allocation6 + $0x970] sm:$0xff] }
 0x185   :  { %v2849_v44 = vpack.c.bf16 %v818_v35, %v813_v34  ;;  %v849_v33 = vld [vmem:[#allocation6 + $0x998] sm:$0xff]  ;;  %v858_v35 = vld [vmem:[#allocation6 + $0x9e0] sm:$0xff] }
 0x186   :  { %2832 = vmatpush1.bf16.msra.mxu0 %v2831_v30  ;;  %3056 = vmatpush1.bf16.msra.mxu1 %v3055_v41  ;;  %v3750_v57 = vpop.f32.mrb[2].mxu0  ;;  %v812_v30 = vld [vmem:[#allocation6 + $0x870] sm:$0xff]  ;;  %v817_v41 = vld [vmem:[#allocation6 + $0x898] sm:$0xff] }
 0x187   :  { %2834 = vmatprep.subr.bf16.mxu0 %v2833_v45  ;;  %3058 = vmatprep.subr.bf16.mxu1 %v3057_v46  ;;  %v3752_v6 = vpop.f32.mrb[3].mxu0  ;;  %v3073_v45 = vpack.c.bf16 %v820_v37, %v815_v36  ;;  %v814_v46 = vld [vmem:[#allocation6 + $0x880] sm:$0xff]  ;;  %v2851_v52 = vpack.c.bf16 %v817_v41, %v812_v30  ;;  %v853_v34 = vld [vmem:[#allocation6 + $0x9b8] sm:$0xff]  ;;  %v855_v36 = vld [vmem:[#allocation6 + $0x9c8] sm:$0xff]  ;;  %v2863_v30 = vpack.c.bf16 %v847_v28, %v842_v27 }
 0x188   :  { %v860_v37 = vld [vmem:[#allocation6 + $0x9f0] sm:$0xff]  ;;  %v3087_v41 = vpack.c.bf16 %v849_v33, %v844_v32  ;;  %v890_v27 = vld [vmem:[#allocation6 + $0xae0] sm:$0xff]  ;;  %v887_v32 = vld [vmem:[#allocation6 + $0xac8] sm:$0xff] }
 0x18a   :  { %2836 = vmatpush1.bf16.msra.mxu0 %v2835_v53  ;;  %3060 = vmatpush1.bf16.msra.mxu1 %v3059_v54  ;;  %v3075_v53 = vpack.c.bf16 %v819_v47, %v814_v46  ;;  %v822_v54 = vld [vmem:[#allocation6 + $0x8c0] sm:$0xff]  ;;  %v3089_v46 = vpack.c.bf16 %v860_v37, %v855_v36  ;;  %v889_v36 = vld [vmem:[#allocation6 + $0xad8] sm:$0xff] }
 0x18b   :  { %2838 = vmatprep.subr.bf16.mxu0 %v2837_v63  ;;  %3062 = vmatprep.subr.bf16.mxu1 %v3061_v2  ;;  %v3077_v63 = vpack.c.bf16 %v830_v51, %v825_v50  ;;  %v824_v2 = vld [vmem:[#allocation6 + $0x8d0] sm:$0xff]  ;;  %v2855_v9 = vpack.c.bf16 %v827_v55, %v822_v54  ;;  %v854_v47 = vld [vmem:[#allocation6 + $0x9c0] sm:$0xff]  ;;  %v865_v51 = vld [vmem:[#allocation6 + $0xa18] sm:$0xff] }
 0x18c   :  { %v868_v50 = vld [vmem:[#allocation6 + $0xa30] sm:$0xff]  ;;  %v893_v37 = vld [vmem:[#allocation6 + $0xaf8] sm:$0xff] }
 0x18d   :  { %v3754_v38 = vpop.f32.mrb[2].mxu1 }
 0x18e   :  { %2840 = vmatpush1.bf16.msra.mxu0 %v2839_v10  ;;  %3064 = vmatpush1.bf16.msra.mxu1 %v3063_v11  ;;  %v2550_v42 = vpop.f32.mrb[3].mxu1  ;;  %v3079_v10 = vpack.c.bf16 %v829_v3, %v824_v2  ;;  %v832_v11 = vld [vmem:[#allocation6 + $0x910] sm:$0xff]  ;;  %v867_v2 = vld [vmem:[#allocation6 + $0xa28] sm:$0xff]  ;;  %v2869_v3 = vpack.c.bf16 %v868_v50, %v863_v49 }
 0x18f   :  { %2842 = vmatprep.subr.bf16.mxu0 %v2841_v14  ;;  %3066 = vmatprep.subr.bf16.mxu1 %v3065_v16  ;;  %v3081_v14 = vpack.c.bf16 %v840_v8, %v835_v7  ;;  %v834_v16 = vld [vmem:[#allocation6 + $0x920] sm:$0xff]  ;;  %v852_v42 = vld [vmem:[#allocation6 + $0x9b0] sm:$0xff]  ;;  %v869_v7 = vld [vmem:[#allocation6 + $0xa38] sm:$0xff] }
 0x190   :  { %v873_v8 = vld [vmem:[#allocation6 + $0xa58] sm:$0xff]  ;;  %v899_v49 = vld [vmem:[#allocation6 + $0xb28] sm:$0xff] }
 0x191   :  { %v903_v50 = vld [vmem:[#allocation6 + $0xb48] sm:$0xff] }
 0x192   :  { %2844 = vmatpush1.bf16.msra.mxu0 %v2843_v24  ;;  %3068 = vmatpush1.bf16.msra.mxu1 %v3067_v25  ;;  %v2859_v24 = vpack.c.bf16 %v837_v12, %v832_v11  ;;  %v3083_v25 = vpack.c.bf16 %v839_v17, %v834_v16  ;;  %v880_v11 = vld [vmem:[#allocation6 + $0xa90] sm:$0xff]  ;;  %v877_v16 = vld [vmem:[#allocation6 + $0xa78] sm:$0xff] }
 0x193   :  { %2846 = vmatprep.subr.bf16.mxu0 %v2845_v29  ;;  %3070 = vmatprep.subr.bf16.mxu1 %v3069_v31  ;;  %v2861_v29 = vpack.c.bf16 %v848_v19, %v843_v18  ;;  %v3085_v31 = vpack.c.bf16 %v850_v22, %v845_v21  ;;  %v874_v19 = vld [vmem:[#allocation6 + $0xa60] sm:$0xff]  ;;  %v879_v21 = vld [vmem:[#allocation6 + $0xa88] sm:$0xff] }
 0x194   :  { %v883_v22 = vld [vmem:[#allocation6 + $0xaa8] sm:$0xff] }
 0x196   :  { %2848 = vmatpush1.bf16.msra.mxu0 %v2847_v39  ;;  %3072 = vmatpush1.bf16.msra.mxu1 %v3071_v40  ;;  %v239_v39 = vsub.s32 5, %v3720_v59  ;;  %v228_v40 = vrot.slane %v3723_v61, %v227_v23 }
 0x197   :  { %2850 = vmatprep.subr.bf16.mxu0 %v2849_v44  ;;  %3074 = vmatprep.subr.bf16.mxu1 %v3073_v45  ;;  %v857_v44 = vld [vmem:[#allocation6 + $0x9d8] sm:$0xff]  ;;  %v2865_v45 = vpack.c.bf16 %v858_v35, %v853_v34  ;;  %v884_v35 = vld [vmem:[#allocation6 + $0xab0] sm:$0xff] }
 0x198   :  { %v390_v54 = vadd.f32 %v3744_v43, %v228_v40  ;;  %v2867_v55 = vpack.c.bf16 %v857_v44, %v852_v42  ;;  %v895_v40 = vld [vmem:[#allocation6 + $0xb08] sm:$0xff]  ;;  %v3103_v42 = vpack.c.bf16 %v889_v36, %v884_v35  ;;  %v892_v44 = vld [vmem:[#allocation6 + $0xaf0] sm:$0xff]  ;;  %v933_v35 = vld [vmem:[#allocation6 + $0xc38] sm:$0xff] }
 0x199   :  { %v938_v36 = vld [vmem:[#allocation6 + $0xc60] sm:$0xff] }
 0x19a   :  { %2852 = vmatpush1.bf16.msra.mxu0 %v2851_v52  ;;  %3076 = vmatpush1.bf16.msra.mxu1 %v3075_v53  ;;  %v870_v52 = vld [vmem:[#allocation6 + $0xa40] sm:$0xff]  ;;  %v240_v53 = vrot.slane %v3723_v61, %v239_v39  ;;  %v3764_v12 = vmax.f32 %v390_v54, 0.0 }
 0x19b   :  { %2854 = vmatprep.subr.bf16.mxu0 %v2853_v56  ;;  %3078 = vmatprep.subr.bf16.mxu1 %v3077_v63  ;;  %v3091_v56 = vpack.c.bf16 %v859_v48, %v854_v47  ;;  %v862_v63 = vld [vmem:[#allocation6 + $0xa00] sm:$0xff]  ;;  %v3093_v4 = vpack.c.bf16 %v870_v52, %v865_v51  ;;  %v908_v51 = vld [vmem:[#allocation6 + $0xb70] sm:$0xff]  ;;  %v905_v52 = vld [vmem:[#allocation6 + $0xb58] sm:$0xff] }
 0x19c   :  { %v463_v61 = vadd.f32 %v3752_v6, %v240_v53  ;;  %v2871_v43 = vpack.c.bf16 %v867_v2, %v862_v63  ;;  %v898_v39 = vld [vmem:[#allocation6 + $0xb20] sm:$0xff]  ;;  %v907_v63 = vld [vmem:[#allocation6 + $0xb68] sm:$0xff]  ;;  %v2885_v2 = vpack.c.bf16 %v908_v51, %v903_v50  ;;  %v945_v50 = vld [vmem:[#allocation6 + $0xc98] sm:$0xff] }
 0x19d   :  { %v894_v48 = vld [vmem:[#allocation6 + $0xb00] sm:$0xff] }
 0x19e   :  { %2856 = vmatpush1.bf16.msra.mxu0 %v2855_v9  ;;  %3080 = vmatpush1.bf16.msra.mxu1 %v3079_v10  ;;  %v878_v9 = vld [vmem:[#allocation6 + $0xa80] sm:$0xff]  ;;  %v875_v10 = vld [vmem:[#allocation6 + $0xa68] sm:$0xff]  ;;  %v3766_v28 = vmax.f32 %v463_v61, 0.0 }
 0x19f   :  { %2858 = vmatprep.subr.bf16.mxu0 %v2857_v13  ;;  %3082 = vmatprep.subr.bf16.mxu1 %v3081_v14  ;;  %v3095_v13 = vpack.c.bf16 %v869_v7, %v864_v5  ;;  %v872_v14 = vld [vmem:[#allocation6 + $0xa50] sm:$0xff]  ;;  %v2873_v17 = vpack.c.bf16 %v878_v9, %v873_v8  ;;  %v3097_v18 = vpack.c.bf16 %v880_v11, %v875_v10  ;;  %v910_v53 = vld [vmem:[#allocation6 + $0xb80] sm:$0xff]  ;;  %v909_v5 = vld [vmem:[#allocation6 + $0xb78] sm:$0xff] }
 0x1a0   :  { %v2875_v6 = vpack.c.bf16 %v877_v16, %v872_v14  ;;  %v913_v7 = vld [vmem:[#allocation6 + $0xb98] sm:$0xff]  ;;  %v918_v8 = vld [vmem:[#allocation6 + $0xbc0] sm:$0xff]  ;;  %v915_v9 = vld [vmem:[#allocation6 + $0xba8] sm:$0xff] }
 0x1a1   :  { %v920_v10 = vld [vmem:[#allocation6 + $0xbd0] sm:$0xff]  ;;  %v2889_v14 = vpack.c.bf16 %v918_v8, %v913_v7  ;;  %v950_v51 = vld [vmem:[#allocation6 + $0xcc0] sm:$0xff]  ;;  %v955_v7 = vld [vmem:[#allocation6 + $0xce8] sm:$0xff] }
 0x1a2   :  { %2860 = vmatpush1.bf16.msra.mxu0 %v2859_v24  ;;  %3084 = vmatpush1.bf16.msra.mxu1 %v3083_v25  ;;  %v888_v24 = vld [vmem:[#allocation6 + $0xad0] sm:$0xff]  ;;  %v885_v25 = vld [vmem:[#allocation6 + $0xab8] sm:$0xff]  ;;  %v3113_v16 = vpack.c.bf16 %v920_v10, %v915_v9 }
 0x1a3   :  { %2862 = vmatprep.subr.bf16.mxu0 %v2861_v29  ;;  %3086 = vmatprep.subr.bf16.mxu1 %v3085_v31  ;;  %v3099_v29 = vpack.c.bf16 %v879_v21, %v874_v19  ;;  %v882_v31 = vld [vmem:[#allocation6 + $0xaa0] sm:$0xff]  ;;  %v2877_v33 = vpack.c.bf16 %v888_v24, %v883_v22  ;;  %v3101_v34 = vpack.c.bf16 %v890_v27, %v885_v25  ;;  %v923_v19 = vld [vmem:[#allocation6 + $0xbe8] sm:$0xff]  ;;  %v928_v21 = vld [vmem:[#allocation6 + $0xc10] sm:$0xff] }
 0x1a4   :  { %v925_v22 = vld [vmem:[#allocation6 + $0xbf8] sm:$0xff]  ;;  %v930_v24 = vld [vmem:[#allocation6 + $0xc20] sm:$0xff]  ;;  %v960_v8 = vld [vmem:[#allocation6 + $0xd10] sm:$0xff] }
 0x1a6   :  { %2864 = vmatpush1.bf16.msra.mxu0 %v2863_v30  ;;  %3088 = vmatpush1.bf16.msra.mxu1 %v3087_v41  ;;  %v900_v30 = vld [vmem:[#allocation6 + $0xb30] sm:$0xff]  ;;  %v2879_v41 = vpack.c.bf16 %v887_v32, %v882_v31  ;;  %v2893_v31 = vpack.c.bf16 %v928_v21, %v923_v19  ;;  %v3117_v32 = vpack.c.bf16 %v930_v24, %v925_v22  ;;  %v965_v19 = vld [vmem:[#allocation6 + $0xd38] sm:$0xff]  ;;  %v970_v21 = vld [vmem:[#allocation6 + $0xd60] sm:$0xff] }
 0x1a7   :  { %2866 = vmatprep.subr.bf16.mxu0 %v2865_v45  ;;  %3090 = vmatprep.subr.bf16.mxu1 %v3089_v46  ;;  %v897_v45 = vld [vmem:[#allocation6 + $0xb18] sm:$0xff]  ;;  %v2881_v46 = vpack.c.bf16 %v898_v39, %v893_v37  ;;  %v3105_v47 = vpack.c.bf16 %v900_v30, %v895_v40  ;;  %v935_v37 = vld [vmem:[#allocation6 + $0xc48] sm:$0xff]  ;;  %v940_v39 = vld [vmem:[#allocation6 + $0xc70] sm:$0xff] }
 0x1a8   :  { %v2883_v54 = vpack.c.bf16 %v897_v45, %v892_v44  ;;  %v2897_v44 = vpack.c.bf16 %v938_v36, %v933_v35  ;;  %v3121_v45 = vpack.c.bf16 %v940_v39, %v935_v37  ;;  %v975_v35 = vld [vmem:[#allocation6 + $0xd88] sm:$0xff]  ;;  %v980_v36 = vld [vmem:[#allocation6 + $0xdb0] sm:$0xff] }
 0x1aa   :  { %2868 = vmatpush1.bf16.msra.mxu0 %v2867_v55  ;;  %3092 = vmatpush1.bf16.msra.mxu1 %v3091_v56  ;;  %v3107_v55 = vpack.c.bf16 %v899_v49, %v894_v48  ;;  %v902_v56 = vld [vmem:[#allocation6 + $0xb40] sm:$0xff]  ;;  %v943_v48 = vld [vmem:[#allocation6 + $0xc88] sm:$0xff]  ;;  %v948_v49 = vld [vmem:[#allocation6 + $0xcb0] sm:$0xff] }
 0x1ab   :  { %2870 = vmatprep.subr.bf16.mxu0 %v2869_v3  ;;  %3094 = vmatprep.subr.bf16.mxu1 %v3093_v4  ;;  %v3109_v3 = vpack.c.bf16 %v910_v53, %v905_v52  ;;  %v904_v4 = vld [vmem:[#allocation6 + $0xb50] sm:$0xff]  ;;  %v2887_v11 = vpack.c.bf16 %v907_v63, %v902_v56  ;;  %v2901_v56 = vpack.c.bf16 %v948_v49, %v943_v48  ;;  %v985_v48 = vld [vmem:[#allocation6 + $0xdd8] sm:$0xff]  ;;  %v990_v49 = vld [vmem:[#allocation6 + $0xe00] sm:$0xff] }
 0x1ac   :  { %v3111_v61 = vpack.c.bf16 %v909_v5, %v904_v4  ;;  %v3125_v63 = vpack.c.bf16 %v950_v51, %v945_v50  ;;  %v953_v4 = vld [vmem:[#allocation6 + $0xcd8] sm:$0xff]  ;;  %v958_v5 = vld [vmem:[#allocation6 + $0xd00] sm:$0xff] }
 0x1ad   :  { %1265 = vmatmul.mubr.f32.vlgmr.msra.gmra.mrb[4].mxu0 %v3764_v12  ;;  %1549 = vmatmul.mubr.f32.vlgmr.msra.gmra.mrb[4].mxu1 %v3764_v12 }
 0x1ae   :  { %2872 = vmatpush1.bf16.msra.mxu0 %v2871_v43  ;;  %3096 = vmatpush1.bf16.msra.mxu1 %v3095_v13  ;;  %v912_v43 = vld [vmem:[#allocation6 + $0xb90] sm:$0xff]  ;;  %v917_v13 = vld [vmem:[#allocation6 + $0xbb8] sm:$0xff] }
 0x1af   :  { %2874 = vmatprep.subr.bf16.mxu0 %v2873_v17  ;;  %3098 = vmatprep.subr.bf16.mxu1 %v3097_v18  ;;  %v914_v17 = vld [vmem:[#allocation6 + $0xba0] sm:$0xff]  ;;  %v919_v18 = vld [vmem:[#allocation6 + $0xbc8] sm:$0xff]  ;;  %v2891_v25 = vpack.c.bf16 %v917_v13, %v912_v43  ;;  %v2905_v43 = vpack.c.bf16 %v958_v5, %v953_v4  ;;  %v3129_v13 = vpack.c.bf16 %v960_v8, %v955_v7  ;;  %v1000_v5 = vld [vmem:[#allocation6 + $0xe50] sm:$0xff] }
 0x1b0   :  { %1335 = vmatprep.mubr.f32.mxu0 %v3766_v28  ;;  %1619 = vmatprep.mubr.f32.mxu1 %v3766_v28  ;;  %v3115_v27 = vpack.c.bf16 %v919_v18, %v914_v17  ;;  %v963_v17 = vld [vmem:[#allocation6 + $0xd28] sm:$0xff]  ;;  %v968_v18 = vld [vmem:[#allocation6 + $0xd50] sm:$0xff] }
 0x1b1   :  { %v995_v4 = vld [vmem:[#allocation6 + $0xe28] sm:$0xff] }
 0x1b2   :  { %2876 = vmatpush1.bf16.msra.mxu0 %v2875_v6  ;;  %3100 = vmatpush1.bf16.msra.mxu1 %v3099_v29  ;;  %v922_v6 = vld [vmem:[#allocation6 + $0xbe0] sm:$0xff]  ;;  %v927_v29 = vld [vmem:[#allocation6 + $0xc08] sm:$0xff] }
 0x1b3   :  { %2878 = vmatprep.subr.bf16.mxu0 %v2877_v33  ;;  %3102 = vmatprep.subr.bf16.mxu1 %v3101_v34  ;;  %v924_v33 = vld [vmem:[#allocation6 + $0xbf0] sm:$0xff]  ;;  %v929_v34 = vld [vmem:[#allocation6 + $0xc18] sm:$0xff]  ;;  %v2895_v40 = vpack.c.bf16 %v927_v29, %v922_v6  ;;  %v2909_v6 = vpack.c.bf16 %v968_v18, %v963_v17  ;;  %v3133_v29 = vpack.c.bf16 %v970_v21, %v965_v19  ;;  %v1010_v18 = vld [vmem:[#allocation6 + $0xea0] sm:$0xff]  ;;  %v235_v19 = vsub.s32 4, %v3720_v59 }
 0x1b4   :  { %v3119_v30 = vpack.c.bf16 %v929_v34, %v924_v33  ;;  %v973_v33 = vld [vmem:[#allocation6 + $0xd78] sm:$0xff]  ;;  %v978_v34 = vld [vmem:[#allocation6 + $0xda0] sm:$0xff] }
 0x1b5   :  { %v1005_v17 = vld [vmem:[#allocation6 + $0xe78] sm:$0xff] }
 0x1b6   :  { %2880 = vmatpush1.bf16.msra.mxu0 %v2879_v41  ;;  %3104 = vmatpush1.bf16.msra.mxu1 %v3103_v42  ;;  %v932_v41 = vld [vmem:[#allocation6 + $0xc30] sm:$0xff]  ;;  %v937_v42 = vld [vmem:[#allocation6 + $0xc58] sm:$0xff] }
 0x1b7   :  { %2882 = vmatprep.subr.bf16.mxu0 %v2881_v46  ;;  %3106 = vmatprep.subr.bf16.mxu1 %v3105_v47  ;;  %v934_v46 = vld [vmem:[#allocation6 + $0xc40] sm:$0xff]  ;;  %v939_v47 = vld [vmem:[#allocation6 + $0xc68] sm:$0xff]  ;;  %v2899_v52 = vpack.c.bf16 %v937_v42, %v932_v41  ;;  %v2913_v41 = vpack.c.bf16 %v978_v34, %v973_v33  ;;  %v3137_v42 = vpack.c.bf16 %v980_v36, %v975_v35  ;;  %v1020_v35 = vld [vmem:[#allocation6 + $0xef0] sm:$0xff] }
 0x1b8   :  { %v3123_v53 = vpack.c.bf16 %v939_v47, %v934_v46  ;;  %v983_v46 = vld [vmem:[#allocation6 + $0xdc8] sm:$0xff]  ;;  %v988_v47 = vld [vmem:[#allocation6 + $0xdf0] sm:$0xff]  ;;  %v1018_v33 = vld [vmem:[#allocation6 + $0xee0] sm:$0xff] }
 0x1b9   :  { %v1015_v34 = vld [vmem:[#allocation6 + $0xec8] sm:$0xff]  ;;  %v3773_v36 = vld [vmem:[#allocation4] sm:$0xff] }
 0x1ba   :  { %2884 = vmatpush1.bf16.msra.mxu0 %v2883_v54  ;;  %3108 = vmatpush1.bf16.msra.mxu1 %v3107_v55  ;;  %v942_v54 = vld [vmem:[#allocation6 + $0xc80] sm:$0xff]  ;;  %v947_v55 = vld [vmem:[#allocation6 + $0xca8] sm:$0xff] }
 0x1bb   :  { %2886 = vmatprep.subr.bf16.mxu0 %v2885_v2  ;;  %3110 = vmatprep.subr.bf16.mxu1 %v3109_v3  ;;  %v944_v2 = vld [vmem:[#allocation6 + $0xc90] sm:$0xff]  ;;  %v949_v3 = vld [vmem:[#allocation6 + $0xcb8] sm:$0xff]  ;;  %v2903_v9 = vpack.c.bf16 %v947_v55, %v942_v54  ;;  %v2917_v54 = vpack.c.bf16 %v988_v47, %v983_v46  ;;  %v3141_v55 = vpack.c.bf16 %v990_v49, %v985_v48  ;;  %v1019_v46 = vld [vmem:[#allocation6 + $0xee8] sm:$0xff] }
 0x1bc   :  { %v3127_v10 = vpack.c.bf16 %v949_v3, %v944_v2  ;;  %v993_v2 = vld [vmem:[#allocation6 + $0xe18] sm:$0xff]  ;;  %v998_v3 = vld [vmem:[#allocation6 + $0xe40] sm:$0xff]  ;;  %v1023_v47 = vld [vmem:[#allocation6 + $0xf08] sm:$0xff] }
 0x1bd   :  { %v1028_v48 = vld [vmem:[#allocation6 + $0xf30] sm:$0xff]  ;;  %v1025_v49 = vld [vmem:[#allocation6 + $0xf18] sm:$0xff] }
 0x1be   :  { %2888 = vmatpush1.bf16.msra.mxu0 %v2887_v11  ;;  %3112 = vmatpush1.bf16.msra.mxu1 %v3111_v61  ;;  %v952_v11 = vld [vmem:[#allocation6 + $0xcd0] sm:$0xff]  ;;  %v957_v61 = vld [vmem:[#allocation6 + $0xcf8] sm:$0xff] }
 0x1bf   :  { %2890 = vmatprep.subr.bf16.mxu0 %v2889_v14  ;;  %3114 = vmatprep.subr.bf16.mxu1 %v3113_v16  ;;  %v954_v14 = vld [vmem:[#allocation6 + $0xce0] sm:$0xff]  ;;  %v959_v16 = vld [vmem:[#allocation6 + $0xd08] sm:$0xff]  ;;  %v2907_v22 = vpack.c.bf16 %v957_v61, %v952_v11  ;;  %v2921_v11 = vpack.c.bf16 %v998_v3, %v993_v2  ;;  %v3145_v61 = vpack.c.bf16 %v1000_v5, %v995_v4  ;;  %v1024_v2 = vld [vmem:[#allocation6 + $0xf10] sm:$0xff] }
 0x1c0   :  { %v3131_v24 = vpack.c.bf16 %v959_v16, %v954_v14  ;;  %v1003_v14 = vld [vmem:[#allocation6 + $0xe68] sm:$0xff]  ;;  %v1008_v16 = vld [vmem:[#allocation6 + $0xe90] sm:$0xff]  ;;  %v1029_v3 = vld [vmem:[#allocation6 + $0xf38] sm:$0xff] }
 0x1c1   :  { %v1033_v4 = vld [vmem:[#allocation6 + $0xf58] sm:$0xff]  ;;  %v1038_v5 = vld [vmem:[#allocation6 + $0xf80] sm:$0xff] }
 0x1c2   :  { %2892 = vmatpush1.bf16.msra.mxu0 %v2891_v25  ;;  %3116 = vmatpush1.bf16.msra.mxu1 %v3115_v27  ;;  %v962_v25 = vld [vmem:[#allocation6 + $0xd20] sm:$0xff]  ;;  %v967_v27 = vld [vmem:[#allocation6 + $0xd48] sm:$0xff] }
 0x1c3   :  { %2894 = vmatprep.subr.bf16.mxu0 %v2893_v31  ;;  %3118 = vmatprep.subr.bf16.mxu1 %v3117_v32  ;;  %v964_v31 = vld [vmem:[#allocation6 + $0xd30] sm:$0xff]  ;;  %v969_v32 = vld [vmem:[#allocation6 + $0xd58] sm:$0xff]  ;;  %v2911_v37 = vpack.c.bf16 %v967_v27, %v962_v25  ;;  %v1007_v25 = vld [vmem:[#allocation6 + $0xe88] sm:$0xff]  ;;  %v2925_v27 = vpack.c.bf16 %v1008_v16, %v1003_v14 }
 0x1c4   :  { %v3135_v39 = vpack.c.bf16 %v969_v32, %v964_v31  ;;  %v1009_v31 = vld [vmem:[#allocation6 + $0xe98] sm:$0xff]  ;;  %v1034_v14 = vld [vmem:[#allocation6 + $0xf60] sm:$0xff]  ;;  %v1039_v16 = vld [vmem:[#allocation6 + $0xf88] sm:$0xff] }
 0x1c5   :  { %v1013_v32 = vld [vmem:[#allocation6 + $0xeb8] sm:$0xff] }
 0x1c6   :  { %2896 = vmatpush1.bf16.msra.mxu0 %v2895_v40  ;;  %3120 = vmatpush1.bf16.msra.mxu1 %v3119_v30  ;;  %v972_v40 = vld [vmem:[#allocation6 + $0xd70] sm:$0xff]  ;;  %v977_v30 = vld [vmem:[#allocation6 + $0xd98] sm:$0xff] }
 0x1c7   :  { %2898 = vmatprep.subr.bf16.mxu0 %v2897_v44  ;;  %3122 = vmatprep.subr.bf16.mxu1 %v3121_v45  ;;  %v974_v44 = vld [vmem:[#allocation6 + $0xd80] sm:$0xff]  ;;  %v979_v45 = vld [vmem:[#allocation6 + $0xda8] sm:$0xff]  ;;  %v2915_v50 = vpack.c.bf16 %v977_v30, %v972_v40  ;;  %v1012_v30 = vld [vmem:[#allocation6 + $0xeb0] sm:$0xff] }
 0x1c8   :  { %v3139_v51 = vpack.c.bf16 %v979_v45, %v974_v44  ;;  %v3153_v44 = vpack.c.bf16 %v1020_v35, %v1015_v34  ;;  %v1014_v45 = vld [vmem:[#allocation6 + $0xec0] sm:$0xff]  ;;  %v1053_v34 = vld [vmem:[#allocation6 + $0xff8] sm:$0xff] }
 0x1c9   :  { %v1058_v35 = vld [vmem:[#allocation6 + $0x1020] sm:$0xff] }
 0x1ca   :  { %2900 = vmatpush1.bf16.msra.mxu0 %v2899_v52  ;;  %3124 = vmatpush1.bf16.msra.mxu1 %v3123_v53  ;;  %v982_v52 = vld [vmem:[#allocation6 + $0xdc0] sm:$0xff]  ;;  %v987_v53 = vld [vmem:[#allocation6 + $0xde8] sm:$0xff] }
 0x1cb   :  { %2902 = vmatprep.subr.bf16.mxu0 %v2901_v56  ;;  %3126 = vmatprep.subr.bf16.mxu1 %v3125_v63  ;;  %v984_v56 = vld [vmem:[#allocation6 + $0xdd0] sm:$0xff]  ;;  %v989_v63 = vld [vmem:[#allocation6 + $0xdf8] sm:$0xff]  ;;  %v2919_v7 = vpack.c.bf16 %v987_v53, %v982_v52  ;;  %v3155_v53 = vpack.c.bf16 %v1019_v46, %v1014_v45  ;;  %v1054_v46 = vld [vmem:[#allocation6 + $0x1000] sm:$0xff] }
 0x1cc   :  { %v3143_v8 = vpack.c.bf16 %v989_v63, %v984_v56  ;;  %v2933_v56 = vpack.c.bf16 %v1028_v48, %v1023_v47  ;;  %v1059_v47 = vld [vmem:[#allocation6 + $0x1028] sm:$0xff] }
 0x1cd   :  { %v1063_v48 = vld [vmem:[#allocation6 + $0x1048] sm:$0xff] }
 0x1ce   :  { %2904 = vmatpush1.bf16.msra.mxu0 %v2903_v9  ;;  %3128 = vmatpush1.bf16.msra.mxu1 %v3127_v10  ;;  %v992_v9 = vld [vmem:[#allocation6 + $0xe10] sm:$0xff]  ;;  %v997_v10 = vld [vmem:[#allocation6 + $0xe38] sm:$0xff] }
 0x1cf   :  { %2906 = vmatprep.subr.bf16.mxu0 %v2905_v43  ;;  %3130 = vmatprep.subr.bf16.mxu1 %v3129_v13  ;;  %v994_v43 = vld [vmem:[#allocation6 + $0xe20] sm:$0xff]  ;;  %v999_v13 = vld [vmem:[#allocation6 + $0xe48] sm:$0xff]  ;;  %v2923_v21 = vpack.c.bf16 %v997_v10, %v992_v9  ;;  %v3159_v10 = vpack.c.bf16 %v1029_v3, %v1024_v2  ;;  %v1064_v2 = vld [vmem:[#allocation6 + $0x1050] sm:$0xff] }
 0x1d0   :  { %v1069_v3 = vld [vmem:[#allocation6 + $0x1078] sm:$0xff] }
 0x1d2   :  { %2908 = vmatpush1.bf16.msra.mxu0 %v2907_v22  ;;  %3132 = vmatpush1.bf16.msra.mxu1 %v3131_v24  ;;  %v3147_v22 = vpack.c.bf16 %v999_v13, %v994_v43  ;;  %v1002_v24 = vld [vmem:[#allocation6 + $0xe60] sm:$0xff]  ;;  %v2937_v43 = vpack.c.bf16 %v1038_v5, %v1033_v4  ;;  %v1073_v4 = vld [vmem:[#allocation6 + $0x1098] sm:$0xff] }
 0x1d3   :  { %2910 = vmatprep.subr.bf16.mxu0 %v2909_v6  ;;  %3134 = vmatprep.subr.bf16.mxu1 %v3133_v29  ;;  %v3149_v6 = vpack.c.bf16 %v1010_v18, %v1005_v17  ;;  %v1004_v29 = vld [vmem:[#allocation6 + $0xe70] sm:$0xff]  ;;  %v1043_v17 = vld [vmem:[#allocation6 + $0xfa8] sm:$0xff]  ;;  %v1078_v5 = vld [vmem:[#allocation6 + $0x10c0] sm:$0xff] }
 0x1d4   :  { %v3151_v40 = vpack.c.bf16 %v1009_v31, %v1004_v29  ;;  %v1048_v18 = vld [vmem:[#allocation6 + $0xfd0] sm:$0xff] }
 0x1d5   :  { %v2941_v29 = vpack.c.bf16 %v1048_v18, %v1043_v17  ;;  %v1083_v17 = vld [vmem:[#allocation6 + $0x10e8] sm:$0xff]  ;;  %v1088_v18 = vld [vmem:[#allocation6 + $0x1110] sm:$0xff] }
 0x1d6   :  { %2912 = vmatpush1.bf16.msra.mxu0 %v2911_v37  ;;  %3136 = vmatpush1.bf16.msra.mxu1 %v3135_v39  ;;  %v236_v37 = vrot.slane %v3773_v36, %v235_v19  ;;  %v2927_v39 = vpack.c.bf16 %v1007_v25, %v1002_v24  ;;  %v3163_v25 = vpack.c.bf16 %v1039_v16, %v1034_v14  ;;  %v1074_v14 = vld [vmem:[#allocation6 + $0x10a0] sm:$0xff]  ;;  %v1079_v16 = vld [vmem:[#allocation6 + $0x10c8] sm:$0xff] }
 0x1d7   :  { %2914 = vmatprep.subr.bf16.mxu0 %v2913_v41  ;;  %3138 = vmatprep.subr.bf16.mxu1 %v3137_v42  ;;  %v1017_v41 = vld [vmem:[#allocation6 + $0xed8] sm:$0xff]  ;;  %v2929_v42 = vpack.c.bf16 %v1018_v33, %v1013_v32  ;;  %v1044_v32 = vld [vmem:[#allocation6 + $0xfb0] sm:$0xff] }
 0x1d8   :  { %v2931_v52 = vpack.c.bf16 %v1017_v41, %v1012_v30  ;;  %v1049_v33 = vld [vmem:[#allocation6 + $0xfd8] sm:$0xff]  ;;  %v1052_v41 = vld [vmem:[#allocation6 + $0xff0] sm:$0xff] }
 0x1d9   :  { %v3167_v30 = vpack.c.bf16 %v1049_v33, %v1044_v32  ;;  %v1084_v33 = vld [vmem:[#allocation6 + $0x10f0] sm:$0xff] }
 0x1da   :  { %2916 = vmatpush1.bf16.msra.mxu0 %v2915_v50  ;;  %3140 = vmatpush1.bf16.msra.mxu1 %v3139_v51  ;;  %v1030_v50 = vld [vmem:[#allocation6 + $0xf40] sm:$0xff]  ;;  %v461_v51 = vadd.f32 %v3750_v57, %v236_v37  ;;  %v1055_v37 = vld [vmem:[#allocation6 + $0x1008] sm:$0xff] }
 0x1db   :  { %2918 = vmatprep.subr.bf16.mxu0 %v2917_v54  ;;  %3142 = vmatprep.subr.bf16.mxu1 %v3141_v55  ;;  %v1022_v54 = vld [vmem:[#allocation6 + $0xf00] sm:$0xff]  ;;  %v1027_v55 = vld [vmem:[#allocation6 + $0xf28] sm:$0xff]  ;;  %v3157_v63 = vpack.c.bf16 %v1030_v50, %v1025_v49  ;;  %v1068_v49 = vld [vmem:[#allocation6 + $0x1070] sm:$0xff] }
 0x1dc   :  { %v3779_v9 = vmax.f32 %v461_v51, 0.0  ;;  %v2935_v57 = vpack.c.bf16 %v1027_v55, %v1022_v54  ;;  %v1065_v50 = vld [vmem:[#allocation6 + $0x1058] sm:$0xff]  ;;  %v1070_v51 = vld [vmem:[#allocation6 + $0x1080] sm:$0xff]  ;;  %v1067_v55 = vld [vmem:[#allocation6 + $0x1068] sm:$0xff] }
 0x1dd   :  { %v1062_v54 = vld [vmem:[#allocation6 + $0x1040] sm:$0xff] }
 0x1de   :  { %2920 = vmatpush1.bf16.msra.mxu0 %v2919_v7  ;;  %3144 = vmatpush1.bf16.msra.mxu1 %v3143_v8  ;;  %v1035_v7 = vld [vmem:[#allocation6 + $0xf68] sm:$0xff]  ;;  %v1040_v8 = vld [vmem:[#allocation6 + $0xf90] sm:$0xff] }
 0x1df   :  { %2922 = vmatprep.subr.bf16.mxu0 %v2921_v11  ;;  %3146 = vmatprep.subr.bf16.mxu1 %v3145_v61  ;;  %v1032_v11 = vld [vmem:[#allocation6 + $0xf50] sm:$0xff]  ;;  %v1037_v61 = vld [vmem:[#allocation6 + $0xf78] sm:$0xff]  ;;  %v3161_v13 = vpack.c.bf16 %v1040_v8, %v1035_v7  ;;  %v1075_v7 = vld [vmem:[#allocation6 + $0x10a8] sm:$0xff] }
 0x1e0   :  { %v2939_v24 = vpack.c.bf16 %v1037_v61, %v1032_v11  ;;  %v1080_v8 = vld [vmem:[#allocation6 + $0x10d0] sm:$0xff]  ;;  %v1077_v61 = vld [vmem:[#allocation6 + $0x10b8] sm:$0xff] }
 0x1e1   :  { %v1072_v11 = vld [vmem:[#allocation6 + $0x1090] sm:$0xff] }
 0x1e2   :  { %2924 = vmatpush1.bf16.msra.mxu0 %v2923_v21  ;;  %3148 = vmatpush1.bf16.msra.mxu1 %v3147_v22  ;;  %v1045_v21 = vld [vmem:[#allocation6 + $0xfb8] sm:$0xff]  ;;  %v1050_v22 = vld [vmem:[#allocation6 + $0xfe0] sm:$0xff] }
 0x1e3   :  { %2926 = vmatprep.subr.bf16.mxu0 %v2925_v27  ;;  %3150 = vmatprep.subr.bf16.mxu1 %v3149_v6  ;;  %v1042_v27 = vld [vmem:[#allocation6 + $0xfa0] sm:$0xff]  ;;  %v1047_v6 = vld [vmem:[#allocation6 + $0xfc8] sm:$0xff]  ;;  %v3165_v31 = vpack.c.bf16 %v1050_v22, %v1045_v21  ;;  %v1085_v21 = vld [vmem:[#allocation6 + $0x10f8] sm:$0xff] }
 0x1e4   :  { %v1090_v22 = vld [vmem:[#allocation6 + $0x1120] sm:$0xff] }
 0x1e5   :  { %v3181_v32 = vpack.c.bf16 %v1090_v22, %v1085_v21  ;;  %v646_v21 = vld [vmem:[#allocation6 + $0x340] sm:$0xff]  ;;  %v651_v22 = vld [vmem:[#allocation6 + $0x368] sm:$0xff] }
 0x1e6   :  { %2928 = vmatpush1.bf16.msra.mxu0 %v2927_v39  ;;  %3152 = vmatpush1.bf16.msra.mxu1 %v3151_v40  ;;  %v1060_v39 = vld [vmem:[#allocation6 + $0x1030] sm:$0xff]  ;;  %v2943_v40 = vpack.c.bf16 %v1047_v6, %v1042_v27  ;;  %v1082_v27 = vld [vmem:[#allocation6 + $0x10e0] sm:$0xff]  ;;  %v1087_v6 = vld [vmem:[#allocation6 + $0x1108] sm:$0xff] }
 0x1e7   :  { %2930 = vmatprep.subr.bf16.mxu0 %v2929_v42  ;;  %3154 = vmatprep.subr.bf16.mxu1 %v3153_v44  ;;  %v1057_v42 = vld [vmem:[#allocation6 + $0x1018] sm:$0xff]  ;;  %v2945_v44 = vpack.c.bf16 %v1058_v35, %v1053_v34  ;;  %v3169_v45 = vpack.c.bf16 %v1060_v39, %v1055_v37  ;;  %v1098_v37 = vld [vmem:[#allocation6 + $0x1160] sm:$0xff]  ;;  %v1095_v39 = vld [vmem:[#allocation6 + $0x1148] sm:$0xff] }
 0x1e8   :  { %v1089_v34 = vld [vmem:[#allocation6 + $0x1118] sm:$0xff] }
 0x1e9   :  { %v1093_v35 = vld [vmem:[#allocation6 + $0x1138] sm:$0xff] }
 0x1ea   :  { %2932 = vmatpush1.bf16.msra.mxu0 %v2931_v52  ;;  %3156 = vmatpush1.bf16.msra.mxu1 %v3155_v53  ;;  %v2947_v52 = vpack.c.bf16 %v1057_v42, %v1052_v41  ;;  %v3171_v53 = vpack.c.bf16 %v1059_v47, %v1054_v46  ;;  %v3183_v41 = vpack.c.bf16 %v1089_v34, %v1084_v33  ;;  %v1092_v42 = vld [vmem:[#allocation6 + $0x1130] sm:$0xff]  ;;  %v726_v33 = vld [vmem:[#allocation6 + $0x5c0] sm:$0xff] }
 0x1eb   :  { %2934 = vmatprep.subr.bf16.mxu0 %v2933_v56  ;;  %3158 = vmatprep.subr.bf16.mxu1 %v3157_v63  ;;  %v2949_v56 = vpack.c.bf16 %v1068_v49, %v1063_v48  ;;  %v3173_v63 = vpack.c.bf16 %v1070_v51, %v1065_v50  ;;  %v2961_v46 = vpack.c.bf16 %v1098_v37, %v1093_v35  ;;  %v1094_v48 = vld [vmem:[#allocation6 + $0x1140] sm:$0xff]  ;;  %v1099_v49 = vld [vmem:[#allocation6 + $0x1168] sm:$0xff]  ;;  %v656_v37 = vld [vmem:[#allocation6 + $0x390] sm:$0xff] }
 0x1ec   :  { %v626_v50 = vld [vmem:[#allocation6 + $0x2a0] sm:$0xff]  ;;  %v631_v51 = vld [vmem:[#allocation6 + $0x2c8] sm:$0xff] }
 0x1ed   :  { %1336 = vmatmul.mubr.f32.vlgmr.msra.gmra.mrb[4].mxu0 %v3779_v9  ;;  %1620 = vmatmul.mubr.f32.vlgmr.msra.gmra.mrb[4].mxu1 %v3779_v9  ;;  %v731_v35 = vld [vmem:[#allocation6 + $0x5e8] sm:$0xff] }
 0x1ee   :  { %2936 = vmatpush1.bf16.msra.mxu0 %v2935_v57  ;;  %3160 = vmatpush1.bf16.msra.mxu1 %v3159_v10  ;;  %v2951_v57 = vpack.c.bf16 %v1067_v55, %v1062_v54  ;;  %v3175_v10 = vpack.c.bf16 %v1069_v3, %v1064_v2  ;;  %v3187_v55 = vpack.c.bf16 %v1099_v49, %v1094_v48  ;;  %v546_v2 = vld [vmem:[#allocation6 + $0x20] sm:$0xff]  ;;  %v551_v3 = vld [vmem:[#allocation6 + $0x48] sm:$0xff] }
 0x1ef   :  { %2938 = vmatprep.subr.bf16.mxu0 %v2937_v43  ;;  %3162 = vmatprep.subr.bf16.mxu1 %v3161_v13  ;;  %v2953_v43 = vpack.c.bf16 %v1078_v5, %v1073_v4  ;;  %v3177_v13 = vpack.c.bf16 %v1080_v8, %v1075_v7  ;;  %v706_v4 = vld [vmem:[#allocation6 + $0x520] sm:$0xff]  ;;  %v711_v5 = vld [vmem:[#allocation6 + $0x548] sm:$0xff]  ;;  %v636_v7 = vld [vmem:[#allocation6 + $0x2f0] sm:$0xff] }
 0x1f0   :  { %1406 = vmatprep.mubr.f32.mxu0 %v3583_v0  ;;  %1690 = vmatprep.mubr.f32.mxu1 %v3583_v0  ;;  %v641_v8 = vld [vmem:[#allocation6 + $0x318] sm:$0xff]  ;;  %v666_v48 = vld [vmem:[#allocation6 + $0x3e0] sm:$0xff]  ;;  %v671_v49 = vld [vmem:[#allocation6 + $0x408] sm:$0xff] }
 0x1f2   :  { %2940 = vmatpush1.bf16.msra.mxu0 %v2939_v24  ;;  %3164 = vmatpush1.bf16.msra.mxu1 %v3163_v25  ;;  %v2955_v24 = vpack.c.bf16 %v1077_v61, %v1072_v11  ;;  %v3179_v25 = vpack.c.bf16 %v1079_v16, %v1074_v14  ;;  %v3191_v11 = vpack.c.bf16 %v551_v3, %v546_v2  ;;  %v716_v14 = vld [vmem:[#allocation6 + $0x570] sm:$0xff]  ;;  %v751_v2 = vld [vmem:[#allocation6 + $0x688] sm:$0xff] }
 0x1f3   :  { %2942 = vmatprep.subr.bf16.mxu0 %v2941_v29  ;;  %3166 = vmatprep.subr.bf16.mxu1 %v3165_v31  ;;  %v243_v29 = vsub.s32 6, %v3720_v59  ;;  %v2957_v31 = vpack.c.bf16 %v1088_v18, %v1083_v17  ;;  %v3193_v16 = vpack.c.bf16 %v641_v8, %v636_v7  ;;  %v721_v18 = vld [vmem:[#allocation6 + $0x598] sm:$0xff]  ;;  %v676_v3 = vld [vmem:[#allocation6 + $0x430] sm:$0xff] }
 0x1f4   :  { %v841_v7 = vld [vmem:[#allocation6 + $0x958] sm:$0xff] }
 0x1f6   :  { %2944 = vmatpush1.bf16.msra.mxu0 %v2943_v40  ;;  %3168 = vmatpush1.bf16.msra.mxu1 %v3167_v30  ;;  %v1100_v40 = vld [vmem:[#allocation6 + $0x1170] sm:$0xff]  ;;  %v2959_v30 = vpack.c.bf16 %v1087_v6, %v1082_v27  ;;  %v3227_v6 = vpack.c.bf16 %v721_v18, %v716_v14  ;;  %v761_v14 = vld [vmem:[#allocation6 + $0x6d8] sm:$0xff]  ;;  %v846_v18 = vld [vmem:[#allocation6 + $0x980] sm:$0xff] }
 0x1f7   :  { %2946 = vmatprep.subr.bf16.mxu0 %v2945_v44  ;;  %3170 = vmatprep.subr.bf16.mxu1 %v3169_v45  ;;  %v1097_v44 = vld [vmem:[#allocation6 + $0x1158] sm:$0xff]  ;;  %v244_v45 = vrot.slane %v3773_v36, %v243_v29  ;;  %v3185_v47 = vpack.c.bf16 %v1100_v40, %v1095_v39  ;;  %v3197_v29 = vpack.c.bf16 %v651_v22, %v646_v21  ;;  %v816_v40 = vld [vmem:[#allocation6 + $0x890] sm:$0xff]  ;;  %v851_v21 = vld [vmem:[#allocation6 + $0x9a8] sm:$0xff] }
 0x1f8   :  { %v2963_v54 = vpack.c.bf16 %v1097_v44, %v1092_v42  ;;  %v661_v39 = vld [vmem:[#allocation6 + $0x3b8] sm:$0xff] }
 0x1f9   :  { %v3201_v42 = vpack.c.bf16 %v661_v39, %v656_v37  ;;  %v581_v44 = vld [vmem:[#allocation6 + $0x138] sm:$0xff] }
 0x1fa   :  { %2948 = vmatpush1.bf16.msra.mxu0 %v2947_v52  ;;  %3172 = vmatpush1.bf16.msra.mxu1 %v3171_v53  ;;  %v786_v52 = vld [vmem:[#allocation6 + $0x7a0] sm:$0xff]  ;;  %v791_v53 = vld [vmem:[#allocation6 + $0x7c8] sm:$0xff]  ;;  %v861_v37 = vld [vmem:[#allocation6 + $0x9f8] sm:$0xff] }
 0x1fb   :  { %2950 = vmatprep.subr.bf16.mxu0 %v2949_v56  ;;  %3174 = vmatprep.subr.bf16.mxu1 %v3173_v63  ;;  %v532_v56 = vadd.f32 %v3754_v38, %v244_v45  ;;  %v3189_v63 = vpack.c.bf16 %v631_v51, %v626_v50  ;;  %v3221_v36 = vpack.c.bf16 %v791_v53, %v786_v52  ;;  %v736_v45 = vld [vmem:[#allocation6 + $0x610] sm:$0xff]  ;;  %v826_v50 = vld [vmem:[#allocation6 + $0x8e0] sm:$0xff]  ;;  %v831_v51 = vld [vmem:[#allocation6 + $0x908] sm:$0xff] }
 0x1fc   :  { %v3223_v38 = vpack.c.bf16 %v711_v5, %v706_v4  ;;  %v681_v4 = vld [vmem:[#allocation6 + $0x458] sm:$0xff]  ;;  %v836_v5 = vld [vmem:[#allocation6 + $0x930] sm:$0xff] }
 0x1fd   :  { %v3788_v61 = vmax.f32 %v532_v56, 0.0  ;;  %v591_v56 = vld [vmem:[#allocation6 + $0x188] sm:$0xff] }
 0x1fe   :  { %2952 = vmatpush1.bf16.msra.mxu0 %v2951_v57  ;;  %3176 = vmatpush1.bf16.msra.mxu1 %v3175_v10  ;;  %v796_v57 = vld [vmem:[#allocation6 + $0x7f0] sm:$0xff]  ;;  %v801_v10 = vld [vmem:[#allocation6 + $0x818] sm:$0xff] }
 0x1ff   :  { %2954 = vmatprep.subr.bf16.mxu0 %v2953_v43  ;;  %3178 = vmatprep.subr.bf16.mxu1 %v3177_v13  ;;  %v556_v43 = vld [vmem:[#allocation6 + $0x70] sm:$0xff]  ;;  %v561_v13 = vld [vmem:[#allocation6 + $0x98] sm:$0xff]  ;;  %v3225_v17 = vpack.c.bf16 %v801_v10, %v796_v57  ;;  %v3209_v10 = vpack.c.bf16 %v681_v4, %v676_v3 }
 0x200   :  { %v3195_v27 = vpack.c.bf16 %v561_v13, %v556_v43  ;;  %v756_v43 = vld [vmem:[#allocation6 + $0x6b0] sm:$0xff]  ;;  %v3241_v13 = vpack.c.bf16 %v841_v7, %v836_v5  ;;  %v1041_v5 = vld [vmem:[#allocation6 + $0xf98] sm:$0xff]  ;;  %v966_v7 = vld [vmem:[#allocation6 + $0xd40] sm:$0xff] }
 0x201   :  { %v1036_v3 = vld [vmem:[#allocation6 + $0xf70] sm:$0xff] }
 0x202   :  { %2956 = vmatpush1.bf16.msra.mxu0 %v2955_v24  ;;  %3180 = vmatpush1.bf16.msra.mxu1 %v3179_v25  ;;  %v806_v24 = vld [vmem:[#allocation6 + $0x840] sm:$0xff]  ;;  %v811_v25 = vld [vmem:[#allocation6 + $0x868] sm:$0xff] }
 0x203   :  { %2958 = vmatprep.subr.bf16.mxu0 %v2957_v31  ;;  %3182 = vmatprep.subr.bf16.mxu1 %v3181_v32  ;;  %v566_v31 = vld [vmem:[#allocation6 + $0xc0] sm:$0xff]  ;;  %v571_v32 = vld [vmem:[#allocation6 + $0xe8] sm:$0xff]  ;;  %v3229_v34 = vpack.c.bf16 %v811_v25, %v806_v24  ;;  %v3243_v24 = vpack.c.bf16 %v761_v14, %v756_v43 }
 0x204   :  { %v891_v43 = vld [vmem:[#allocation6 + $0xae8] sm:$0xff] }
 0x205   :  { %v1051_v14 = vld [vmem:[#allocation6 + $0xfe8] sm:$0xff] }
 0x206   :  { %2960 = vmatpush1.bf16.msra.mxu0 %v2959_v30  ;;  %3184 = vmatpush1.bf16.msra.mxu1 %v3183_v41  ;;  %v821_v30 = vld [vmem:[#allocation6 + $0x8b8] sm:$0xff]  ;;  %v3199_v41 = vpack.c.bf16 %v571_v32, %v566_v31  ;;  %v3245_v31 = vpack.c.bf16 %v851_v21, %v846_v18  ;;  %v771_v32 = vld [vmem:[#allocation6 + $0x728] sm:$0xff]  ;;  %v896_v18 = vld [vmem:[#allocation6 + $0xb10] sm:$0xff] }
 0x207   :  { %2962 = vmatprep.subr.bf16.mxu0 %v2961_v46  ;;  %3186 = vmatprep.subr.bf16.mxu1 %v3185_v47  ;;  %v3233_v46 = vpack.c.bf16 %v821_v30, %v816_v40  ;;  %v741_v47 = vld [vmem:[#allocation6 + $0x638] sm:$0xff] }
 0x208   :  { %v3235_v53 = vpack.c.bf16 %v741_v47, %v736_v45  ;;  %v946_v45 = vld [vmem:[#allocation6 + $0xca0] sm:$0xff]  ;;  %v901_v21 = vld [vmem:[#allocation6 + $0xb38] sm:$0xff] }
 0x20a   :  { %2964 = vmatpush1.bf16.msra.mxu0 %v2963_v54  ;;  %3188 = vmatpush1.bf16.msra.mxu1 %v3187_v55  ;;  %v3205_v54 = vpack.c.bf16 %v671_v49, %v666_v48  ;;  %v586_v55 = vld [vmem:[#allocation6 + $0x160] sm:$0xff] }
 0x20b   :  { %3190 = vmatprep.subr.bf16.mxu0 %v3189_v63  ;;  %3222 = vmatprep.subr.bf16.mxu1 %v3221_v36  ;;  %v746_v63 = vld [vmem:[#allocation6 + $0x660] sm:$0xff]  ;;  %v3237_v36 = vpack.c.bf16 %v831_v51, %v826_v50  ;;  %v3207_v8 = vpack.c.bf16 %v591_v56, %v586_v55  ;;  %v871_v51 = vld [vmem:[#allocation6 + $0xa48] sm:$0xff]  ;;  %v961_v55 = vld [vmem:[#allocation6 + $0xd18] sm:$0xff] }
 0x20c   :  { %v3239_v57 = vpack.c.bf16 %v751_v2, %v746_v63  ;;  %v866_v50 = vld [vmem:[#allocation6 + $0xa20] sm:$0xff]  ;;  %v881_v2 = vld [vmem:[#allocation6 + $0xa98] sm:$0xff] }
 0x20d   :  { %1407 = vmatmul.mubr.f32.vlgmr.msra.gmra.mrb[4].mxu0 %v3788_v61  ;;  %1691 = vmatmul.mubr.f32.vlgmr.msra.gmra.mrb[4].mxu1 %v3788_v61  ;;  %v3255_v56 = vpack.c.bf16 %v871_v51, %v866_v50  ;;  %v926_v50 = vld [vmem:[#allocation6 + $0xc00] sm:$0xff]  ;;  %v931_v51 = vld [vmem:[#allocation6 + $0xc28] sm:$0xff] }
 0x20e   :  { %3192 = vmatpush3.bf16.msra.mxu0 %v3191_v11  ;;  %1761 = vmatprep.mubr.f32.mxu0 %v3732_v15  ;;  %v3231_v15 = vpack.c.bf16 %v731_v35, %v726_v33  ;;  %v596_v11 = vld [vmem:[#allocation6 + $0x1b0] sm:$0xff] }
 0x20f   :  { %3224 = vmatpush3.bf16.msra.mxu1 %v3223_v38  ;;  %1831 = vmatprep.mubr.f32.mxu1 %v3746_v58  ;;  %v576_v58 = vld [vmem:[#allocation6 + $0x110] sm:$0xff]  ;;  %v601_v38 = vld [vmem:[#allocation6 + $0x1d8] sm:$0xff] }
 0x210   :  { %3194 = vmatprep.subr.bf16.mxu0 %v3193_v16  ;;  %3226 = vmatprep.subr.bf16.mxu1 %v3225_v17  ;;  %v3203_v52 = vpack.c.bf16 %v581_v44, %v576_v58  ;;  %v686_v16 = vld [vmem:[#allocation6 + $0x480] sm:$0xff]  ;;  %v691_v17 = vld [vmem:[#allocation6 + $0x4a8] sm:$0xff]  ;;  %v3211_v22 = vpack.c.bf16 %v601_v38, %v596_v11  ;;  %v696_v33 = vld [vmem:[#allocation6 + $0x4d0] sm:$0xff] }
 0x211   :  { %v3213_v25 = vpack.c.bf16 %v691_v17, %v686_v16  ;;  %v856_v35 = vld [vmem:[#allocation6 + $0x9d0] sm:$0xff]  ;;  %v781_v44 = vld [vmem:[#allocation6 + $0x778] sm:$0xff]  ;;  %v886_v38 = vld [vmem:[#allocation6 + $0xac0] sm:$0xff] }
 0x212   :  { %3196 = vmatpush3.bf16.msra.mxu0 %v3195_v27  ;;  %v606_v27 = vld [vmem:[#allocation6 + $0x200] sm:$0xff]  ;;  %v3249_v58 = vpack.c.bf16 %v861_v37, %v856_v35  ;;  %v976_v16 = vld [vmem:[#allocation6 + $0xd90] sm:$0xff]  ;;  %v981_v17 = vld [vmem:[#allocation6 + $0xdb8] sm:$0xff] }
 0x213   :  { %3228 = vmatpush3.bf16.msra.mxu1 %v3227_v6  ;;  %3198 = vmatprep.subr.bf16.mxu0 %v3197_v29  ;;  %v611_v6 = vld [vmem:[#allocation6 + $0x228] sm:$0xff]  ;;  %v766_v29 = vld [vmem:[#allocation6 + $0x700] sm:$0xff]  ;;  %v996_v37 = vld [vmem:[#allocation6 + $0xe30] sm:$0xff] }
 0x214   :  { %3230 = vmatprep.subr.bf16.mxu1 %v3229_v34  ;;  %v701_v34 = vld [vmem:[#allocation6 + $0x4f8] sm:$0xff]  ;;  %v3215_v39 = vpack.c.bf16 %v611_v6, %v606_v27  ;;  %v3247_v40 = vpack.c.bf16 %v771_v32, %v766_v29  ;;  %v991_v27 = vld [vmem:[#allocation6 + $0xe08] sm:$0xff]  ;;  %v3267_v6 = vpack.c.bf16 %v901_v21, %v896_v18  ;;  %v906_v32 = vld [vmem:[#allocation6 + $0xb60] sm:$0xff] }
 0x215   :  { %v3217_v30 = vpack.c.bf16 %v701_v34, %v696_v33  ;;  %v911_v33 = vld [vmem:[#allocation6 + $0xb88] sm:$0xff]  ;;  %v1066_v34 = vld [vmem:[#allocation6 + $0x1060] sm:$0xff]  ;;  %v2032_v18 = vld [vmem:[#allocation9 + $0x190] sm:$0xff] }
 0x216   :  { %3200 = vmatpush3.bf16.msra.mxu0 %v3199_v41  ;;  %v616_v41 = vld [vmem:[#allocation6 + $0x250] sm:$0xff]  ;;  %v1071_v35 = vld [vmem:[#allocation6 + $0x1088] sm:$0xff]  ;;  %v2033_v21 = vld [vmem:[#allocation9 + $0x198] sm:$0xff] }
 0x217   :  { %3232 = vmatpush3.bf16.msra.mxu1 %v3231_v15  ;;  %3202 = vmatprep.subr.bf16.mxu0 %v3201_v42  ;;  %v621_v15 = vld [vmem:[#allocation6 + $0x278] sm:$0xff]  ;;  %v776_v42 = vld [vmem:[#allocation6 + $0x750] sm:$0xff] }
 0x218   :  { %3234 = vmatprep.subr.bf16.mxu1 %v3233_v46  ;;  %v951_v46 = vld [vmem:[#allocation6 + $0xcc8] sm:$0xff]  ;;  %v3219_v47 = vpack.c.bf16 %v621_v15, %v616_v41  ;;  %v3251_v48 = vpack.c.bf16 %v781_v44, %v776_v42  ;;  %v916_v15 = vld [vmem:[#allocation6 + $0xbb0] sm:$0xff]  ;;  %v921_v42 = vld [vmem:[#allocation6 + $0xbd8] sm:$0xff] }
 0x219   :  { %v3253_v49 = vpack.c.bf16 %v951_v46, %v946_v45  ;;  %v1081_v44 = vld [vmem:[#allocation6 + $0x10d8] sm:$0xff]  ;;  %v1006_v45 = vld [vmem:[#allocation6 + $0xe80] sm:$0xff]  ;;  %v1011_v46 = vld [vmem:[#allocation6 + $0xea8] sm:$0xff] }
 0x21a   :  { %3204 = vmatpush3.bf16.msra.mxu0 %v3203_v52  ;;  %v1026_v52 = vld [vmem:[#allocation6 + $0xf20] sm:$0xff] }
 0x21b   :  { %3236 = vmatpush3.bf16.msra.mxu1 %v3235_v53  ;;  %3206 = vmatprep.subr.bf16.mxu0 %v3205_v54  ;;  %v1031_v53 = vld [vmem:[#allocation6 + $0xf48] sm:$0xff]  ;;  %v956_v54 = vld [vmem:[#allocation6 + $0xcf0] sm:$0xff] }
 0x21c   :  { %3238 = vmatprep.subr.bf16.mxu1 %v3237_v36  ;;  %v3286_v63 = vpack.c.bf16 %v1031_v53, %v1026_v52  ;;  %v876_v36 = vld [vmem:[#allocation6 + $0xa70] sm:$0xff]  ;;  %v3257_v4 = vpack.c.bf16 %v961_v55, %v956_v54  ;;  %v1086_v52 = vld [vmem:[#allocation6 + $0x1100] sm:$0xff]  ;;  %v1091_v53 = vld [vmem:[#allocation6 + $0x1128] sm:$0xff] }
 0x21d   :  { %v1016_v54 = vld [vmem:[#allocation6 + $0xed0] sm:$0xff]  ;;  %v1021_v55 = vld [vmem:[#allocation6 + $0xef8] sm:$0xff] }
 0x21e   :  { %3208 = vmatpush3.bf16.msra.mxu0 %v3207_v8  ;;  %v971_v8 = vld [vmem:[#allocation6 + $0xd68] sm:$0xff] }
 0x21f   :  { %3240 = vmatpush3.bf16.msra.mxu1 %v3239_v57  ;;  %3210 = vmatprep.subr.bf16.mxu0 %v3209_v10  ;;  %v3259_v57 = vpack.c.bf16 %v881_v2, %v876_v36  ;;  %v3289_v10 = vpack.c.bf16 %v1041_v5, %v1036_v3  ;;  %v3261_v11 = vpack.c.bf16 %v971_v8, %v966_v7  ;;  %v936_v2 = vld [vmem:[#allocation6 + $0xc50] sm:$0xff]  ;;  %v941_v3 = vld [vmem:[#allocation6 + $0xc78] sm:$0xff]  ;;  %v1998_v7 = vld [vmem:[#allocation9 + $0x80] sm:$0xff] }
 0x220   :  { %3242 = vmatprep.subr.bf16.mxu1 %v3241_v13  ;;  %v1046_v13 = vld [vmem:[#allocation6 + $0xfc0] sm:$0xff]  ;;  %v3281_v36 = vpack.c.bf16 %v1021_v55, %v1016_v54  ;;  %v1101_v5 = vld [vmem:[#allocation6 + $0x1178] sm:$0xff]  ;;  %v1999_v8 = vld [vmem:[#allocation9 + $0x88] sm:$0xff] }
 0x221   :  { %v2021_v54 = vld [vmem:[#allocation9 + $0x138] sm:$0xff]  ;;  %v2006_v55 = vld [vmem:[#allocation9 + $0xc0] sm:$0xff] }
 0x222   :  { %3212 = vmatpush3.bf16.msra.mxu0 %v3211_v22  ;;  %v1056_v22 = vld [vmem:[#allocation6 + $0x1010] sm:$0xff] }
 0x223   :  { %3244 = vmatpush3.bf16.msra.mxu1 %v3243_v24  ;;  %3214 = vmatprep.subr.bf16.mxu0 %v3213_v25  ;;  %v1061_v24 = vld [vmem:[#allocation6 + $0x1038] sm:$0xff]  ;;  %v986_v25 = vld [vmem:[#allocation6 + $0xde0] sm:$0xff] }
 0x224   :  { %3246 = vmatprep.subr.bf16.mxu1 %v3245_v31  ;;  %v3295_v29 = vpack.c.bf16 %v1061_v24, %v1056_v22  ;;  %v3269_v31 = vpack.c.bf16 %v991_v27, %v986_v25  ;;  %v1984_v27 = vld [vmem:[#allocation9 + $0x10] sm:$0xff] }
 0x226   :  { %3216 = vmatpush3.bf16.msra.mxu0 %v3215_v39  ;;  %v1001_v39 = vld [vmem:[#allocation6 + $0xe58] sm:$0xff] }
 0x227   :  { %3248 = vmatpush3.bf16.msra.mxu1 %v3247_v40  ;;  %3218 = vmatprep.subr.bf16.mxu0 %v3217_v30  ;;  %v3271_v40 = vpack.c.bf16 %v911_v33, %v906_v32  ;;  %v3298_v30 = vpack.c.bf16 %v1071_v35, %v1066_v34  ;;  %v3273_v41 = vpack.c.bf16 %v1001_v39, %v996_v37  ;;  %v2017_v32 = vld [vmem:[#allocation9 + $0x118] sm:$0xff]  ;;  %v2002_v33 = vld [vmem:[#allocation9 + $0xa0] sm:$0xff]  ;;  %v2003_v34 = vld [vmem:[#allocation9 + $0xa8] sm:$0xff] }
 0x228   :  { %3250 = vmatprep.subr.bf16.mxu1 %v3249_v58  ;;  %v1076_v58 = vld [vmem:[#allocation6 + $0x10b0] sm:$0xff]  ;;  %v2034_v35 = vld [vmem:[#allocation9 + $0x1a0] sm:$0xff] }
 0x229   :  { %v2035_v37 = vld [vmem:[#allocation9 + $0x1a8] sm:$0xff] }
 0x22a   :  { %3220 = vmatpush3.bf16.msra.mxu0 %v3219_v47  ;;  %v3275_v47 = vpack.c.bf16 %v921_v42, %v916_v15  ;;  %v1987_v15 = vld [vmem:[#allocation9 + $0x28] sm:$0xff]  ;;  %v2018_v42 = vld [vmem:[#allocation9 + $0x120] sm:$0xff] }
 0x22b   :  { %3252 = vmatpush3.bf16.msra.mxu1 %v3251_v48  ;;  %3254 = vmatprep.subr.bf16.mxu0 %v3253_v49  ;;  %v3301_v48 = vpack.c.bf16 %v1081_v44, %v1076_v58  ;;  %v3277_v49 = vpack.c.bf16 %v1011_v46, %v1006_v45  ;;  %v3349_v58 = vpack.c.bf16 %v2035_v37, %v2034_v35  ;;  %v2019_v44 = vld [vmem:[#allocation9 + $0x128] sm:$0xff]  ;;  %v2004_v45 = vld [vmem:[#allocation9 + $0xb0] sm:$0xff]  ;;  %v2005_v46 = vld [vmem:[#allocation9 + $0xb8] sm:$0xff] }
 0x22c   :  { %3285 = vmatprep.subr.bf16.mxu1 %v3584_v1  ;;  %v2026_v35 = vld [vmem:[#allocation9 + $0x160] sm:$0xff]  ;;  %v2027_v37 = vld [vmem:[#allocation9 + $0x168] sm:$0xff] }
 0x22d   :  { %1762 = vmatmul.mubr.f32.vlgmr.msra.gmra.mrb[6].mxu0 %v3734_v20  ;;  %v3263_v20 = vpack.c.bf16 %v891_v43, %v886_v38  ;;  %v3309_v43 = vpack.c.bf16 %v1999_v8, %v1998_v7  ;;  %v1991_v7 = vld [vmem:[#allocation9 + $0x48] sm:$0xff]  ;;  %v2022_v8 = vld [vmem:[#allocation9 + $0x140] sm:$0xff] }
 0x22e   :  { %1832 = vmatmul.mubr.f32.vlgmr.msra.gmra.mrb[6].mxu1 %v3764_v12  ;;  %3256 = vmatpush3.bf16.msra.mxu0 %v3255_v56  ;;  %v3292_v12 = vpack.c.bf16 %v1051_v14, %v1046_v13  ;;  %v3279_v56 = vpack.c.bf16 %v931_v51, %v926_v50  ;;  %v1982_v13 = vld [vmem:[#allocation9] sm:$0xff]  ;;  %v1983_v14 = vld [vmem:[#allocation9 + $0x8] sm:$0xff]  ;;  %v1988_v50 = vld [vmem:[#allocation9 + $0x30] sm:$0xff] }
 0x22f   :  { %1901 = vmatprep.mubr.f32.mxu0 %v3766_v28  ;;  %3287 = vmatpush3.bf16.msra.mxu1 %v3286_v63  ;;  %v3265_v28 = vpack.c.bf16 %v981_v17, %v976_v16  ;;  %v3304_v63 = vpack.c.bf16 %v1091_v53, %v1086_v52  ;;  %v2014_v16 = vld [vmem:[#allocation9 + $0x100] sm:$0xff]  ;;  %v3311_v22 = vpack.c.bf16 %v1983_v14, %v1982_v13  ;;  %v1989_v51 = vld [vmem:[#allocation9 + $0x38] sm:$0xff]  ;;  %v2020_v52 = vld [vmem:[#allocation9 + $0x130] sm:$0xff] }
 0x230   :  { %3258 = vmatprep.subr.bf16.mxu0 %v3257_v4  ;;  %3288 = vmatprep.subr.bf16.mxu1 %v3584_v1  ;;  %v1096_v4 = vld [vmem:[#allocation6 + $0x1150] sm:$0xff]  ;;  %v2041_v13 = vld [vmem:[#allocation9 + $0x1d8] sm:$0xff] }
 0x231   :  { %2583 = vmatprep.mubr.msk.f32.mxu1 %vm3585_vm0, %v3583_v0  ;;  %v3307_v38 = vpack.c.bf16 %v1101_v5, %v1096_v4  ;;  %v1990_v5 = vld [vmem:[#allocation9 + $0x40] sm:$0xff] }
 0x232   :  { %3260 = vmatpush3.bf16.msra.mxu0 %v3259_v57  ;;  %v2030_v57 = vld [vmem:[#allocation9 + $0x180] sm:$0xff]  ;;  %v3327_v14 = vpack.c.bf16 %v1991_v7, %v1990_v5 }
 0x233   :  { %3290 = vmatpush3.bf16.msra.mxu1 %v3289_v10  ;;  %3262 = vmatprep.subr.bf16.mxu0 %v3261_v11  ;;  %v2031_v10 = vld [vmem:[#allocation9 + $0x188] sm:$0xff]  ;;  %v3283_v11 = vpack.c.bf16 %v941_v3, %v936_v2  ;;  %v3323_v2 = vpack.c.bf16 %v1989_v51, %v1988_v50  ;;  %v3355_v3 = vpack.c.bf16 %v2021_v54, %v2020_v52 }
 0x234   :  { %3291 = vmatprep.subr.bf16.mxu1 %v3584_v1  ;;  %v3341_v17 = vpack.c.bf16 %v2031_v10, %v2030_v57  ;;  %v2023_v10 = vld [vmem:[#allocation9 + $0x148] sm:$0xff] }
 0x236   :  { %3264 = vmatpush3.bf16.msra.mxu0 %v3263_v20  ;;  %v2015_v20 = vld [vmem:[#allocation9 + $0x108] sm:$0xff] }
 0x237   :  { %3293 = vmatpush3.bf16.msra.mxu1 %v3292_v12  ;;  %3266 = vmatprep.subr.bf16.mxu0 %v3265_v28  ;;  %v2000_v12 = vld [vmem:[#allocation9 + $0x90] sm:$0xff]  ;;  %v2001_v28 = vld [vmem:[#allocation9 + $0x98] sm:$0xff]  ;;  %v3343_v24 = vpack.c.bf16 %v2015_v20, %v2014_v16  ;;  %v3359_v16 = vpack.c.bf16 %v2023_v10, %v2022_v8 }
 0x238   :  { %3294 = vmatprep.subr.bf16.mxu1 %v3584_v1  ;;  %v3313_v25 = vpack.c.bf16 %v2001_v28, %v2000_v12  ;;  %v1992_v20 = vld [vmem:[#allocation9 + $0x50] sm:$0xff]  ;;  %v1993_v12 = vld [vmem:[#allocation9 + $0x58] sm:$0xff] }
 0x239   :  { %v2024_v28 = vld [vmem:[#allocation9 + $0x150] sm:$0xff] }
 0x23a   :  { %3268 = vmatpush3.bf16.msra.mxu0 %v3267_v6  ;;  %v1985_v6 = vld [vmem:[#allocation9 + $0x18] sm:$0xff] }
 0x23b   :  { %3296 = vmatpush3.bf16.msra.mxu1 %v3295_v29  ;;  %3270 = vmatprep.subr.bf16.mxu0 %v3269_v31  ;;  %v2016_v29 = vld [vmem:[#allocation9 + $0x110] sm:$0xff]  ;;  %v3345_v31 = vpack.c.bf16 %v2033_v21, %v2032_v18  ;;  %v3315_v39 = vpack.c.bf16 %v1985_v6, %v1984_v27  ;;  %v2025_v21 = vld [vmem:[#allocation9 + $0x158] sm:$0xff]  ;;  %v2043_v27 = vld [vmem:[#allocation9 + $0x1e8] sm:$0xff]  ;;  %v3331_v6 = vpack.c.bf16 %v1993_v12, %v1992_v20 }
 0x23c   :  { %3297 = vmatprep.subr.bf16.mxu1 %v3584_v1  ;;  %v2054_v20 = vld [vmem:[#allocation9 + $0x240] sm:$0xff]  ;;  %v2055_v12 = vld [vmem:[#allocation9 + $0x248] sm:$0xff] }
 0x23e   :  { %3272 = vmatpush3.bf16.msra.mxu0 %v3271_v40  ;;  %v3347_v40 = vpack.c.bf16 %v2017_v32, %v2016_v29  ;;  %v3363_v29 = vpack.c.bf16 %v2025_v21, %v2024_v28  ;;  %v1994_v32 = vld [vmem:[#allocation9 + $0x60] sm:$0xff]  ;;  %v3386_v28 = vpack.c.bf16 %v2055_v12, %v2054_v20 }
 0x23f   :  { %3299 = vmatpush3.bf16.msra.mxu1 %v3298_v30  ;;  %3274 = vmatprep.subr.bf16.mxu0 %v3273_v41  ;;  %v3317_v30 = vpack.c.bf16 %v2003_v34, %v2002_v33  ;;  %v1986_v41 = vld [vmem:[#allocation9 + $0x20] sm:$0xff]  ;;  %v1995_v33 = vld [vmem:[#allocation9 + $0x68] sm:$0xff] }
 0x240   :  { %3300 = vmatprep.subr.bf16.mxu1 %v3584_v1 }
 0x242   :  { %3276 = vmatpush3.bf16.msra.mxu0 %v3275_v47  ;;  %v2036_v47 = vld [vmem:[#allocation9 + $0x1b0] sm:$0xff] }
 0x243   :  { %3302 = vmatpush3.bf16.msra.mxu1 %v3301_v48  ;;  %3278 = vmatprep.subr.bf16.mxu0 %v3277_v49  ;;  %v3319_v48 = vpack.c.bf16 %v1987_v15, %v1986_v41  ;;  %v3321_v49 = vpack.c.bf16 %v2005_v46, %v2004_v45  ;;  %v3335_v41 = vpack.c.bf16 %v1995_v33, %v1994_v32  ;;  %v2045_v15 = vld [vmem:[#allocation9 + $0x1f8] sm:$0xff] }
 0x244   :  { %3303 = vmatprep.subr.bf16.mxu1 %v3584_v1  ;;  %v1997_v45 = vld [vmem:[#allocation9 + $0x78] sm:$0xff] }
 0x246   :  { %3280 = vmatpush3.bf16.msra.mxu0 %v3279_v56  ;;  %v2007_v56 = vld [vmem:[#allocation9 + $0xc8] sm:$0xff] }
 0x247   :  { %3305 = vmatpush3.bf16.msra.mxu1 %v3304_v63  ;;  %3282 = vmatprep.subr.bf16.mxu0 %v3281_v36  ;;  %v2038_v63 = vld [vmem:[#allocation9 + $0x1c0] sm:$0xff]  ;;  %v2039_v36 = vld [vmem:[#allocation9 + $0x1c8] sm:$0xff]  ;;  %v3325_v4 = vpack.c.bf16 %v2007_v56, %v2006_v55 }
 0x248   :  { %3306 = vmatprep.subr.bf16.mxu1 %v3584_v1  ;;  %v3357_v57 = vpack.c.bf16 %v2039_v36, %v2038_v63 }
 0x24a   :  { %3284 = vmatpush3.bf16.msra.mxu0 %v3283_v11  ;;  %v2008_v11 = vld [vmem:[#allocation9 + $0xd0] sm:$0xff] }
 0x24b   :  { %3308 = vmatpush3.bf16.msra.mxu1 %v3307_v38  ;;  %3310 = vmatprep.subr.bf16.mxu0 %v3309_v43  ;;  %v2009_v38 = vld [vmem:[#allocation9 + $0xd8] sm:$0xff]  ;;  %v2040_v43 = vld [vmem:[#allocation9 + $0x1d0] sm:$0xff] }
 0x24c   :  { %3342 = vmatprep.subr.bf16.mxu1 %v3341_v17  ;;  %v3329_v17 = vpack.c.bf16 %v2009_v38, %v2008_v11  ;;  %v3361_v18 = vpack.c.bf16 %v2041_v13, %v2040_v43  ;;  %v2048_v11 = vld [vmem:[#allocation9 + $0x210] sm:$0xff]  ;;  %v2050_v38 = vld [vmem:[#allocation9 + $0x220] sm:$0xff]  ;;  %v2051_v43 = vld [vmem:[#allocation9 + $0x228] sm:$0xff] }
 0x24d   :  { %1902 = vmatmul.mubr.f32.vlgmr.msra.gmra.mrb[8].mxu0 %v3779_v9  ;;  %v2037_v9 = vld [vmem:[#allocation9 + $0x1b8] sm:$0xff]  ;;  %v3380_v13 = vpack.c.bf16 %v2051_v43, %v2050_v38 }
 0x24e   :  { %2584 = vmatmul.mubr.f32.vlgmr.msra.gmra.mrb[8].mxu1 %v3788_v61  ;;  %3312 = vmatpush3.bf16.msra.mxu0 %v3311_v22  ;;  %v3351_v61 = vpack.c.bf16 %v2019_v44, %v2018_v42  ;;  %v3353_v53 = vpack.c.bf16 %v2037_v9, %v2036_v47  ;;  %v2010_v22 = vld [vmem:[#allocation9 + $0xe0] sm:$0xff]  ;;  %v3367_v42 = vpack.c.bf16 %v2027_v37, %v2026_v35  ;;  %v1996_v44 = vld [vmem:[#allocation9 + $0x70] sm:$0xff]  ;;  %v2029_v9 = vld [vmem:[#allocation9 + $0x178] sm:$0xff] }
 0x24f   :  { %3344 = vmatpush3.bf16.msra.mxu1 %v3343_v24  ;;  %3314 = vmatprep.subr.bf16.mxu0 %v3313_v25  ;;  %v2011_v24 = vld [vmem:[#allocation9 + $0xe8] sm:$0xff]  ;;  %v2042_v25 = vld [vmem:[#allocation9 + $0x1e0] sm:$0xff]  ;;  %v2028_v47 = vld [vmem:[#allocation9 + $0x170] sm:$0xff] }
 0x250   :  { %3346 = vmatprep.subr.bf16.mxu1 %v3345_v31  ;;  %v3333_v31 = vpack.c.bf16 %v2011_v24, %v2010_v22  ;;  %v3365_v34 = vpack.c.bf16 %v2043_v27, %v2042_v25  ;;  %v2058_v22 = vld [vmem:[#allocation9 + $0x260] sm:$0xff]  ;;  %v2059_v24 = vld [vmem:[#allocation9 + $0x268] sm:$0xff]  ;;  %v2060_v27 = vld [vmem:[#allocation9 + $0x270] sm:$0xff] }
 0x251   :  { %v3392_v25 = vpack.c.bf16 %v2059_v24, %v2058_v22 }
 0x252   :  { %3316 = vmatpush3.bf16.msra.mxu0 %v3315_v39  ;;  %v2012_v39 = vld [vmem:[#allocation9 + $0xf0] sm:$0xff] }
 0x253   :  { %3348 = vmatpush3.bf16.msra.mxu1 %v3347_v40  ;;  %3318 = vmatprep.subr.bf16.mxu0 %v3317_v30  ;;  %v2013_v40 = vld [vmem:[#allocation9 + $0xf8] sm:$0xff]  ;;  %v2044_v30 = vld [vmem:[#allocation9 + $0x1f0] sm:$0xff] }
 0x254   :  { %3350 = vmatprep.subr.bf16.mxu1 %v3349_v58  ;;  %v3337_v58 = vpack.c.bf16 %v2013_v40, %v2012_v39  ;;  %v3369_v46 = vpack.c.bf16 %v2045_v15, %v2044_v30 }
 0x256   :  { %3320 = vmatpush3.bf16.msra.mxu0 %v3319_v48  ;;  %v3339_v48 = vpack.c.bf16 %v1997_v45, %v1996_v44 }
 0x257   :  { %3352 = vmatpush3.bf16.msra.mxu1 %v3351_v61  ;;  %3322 = vmatprep.subr.bf16.mxu0 %v3321_v49  ;;  %v3371_v61 = vpack.c.bf16 %v2029_v9, %v2028_v47  ;;  %v1102_v49 = vld [vmem:[#allocation7] sm:$0x1f]  ;;  %v2289_v9 = vld [vmem:[#allocation10] ss:$0 sm:$0xff] }
 0x258   :  { %3354 = vmatprep.subr.bf16.mxu1 %v3353_v53  ;;  %v1107_v50 = vrot.slane %v1102_v49, %v219_v60  ;;  %v1115_v51 = vrot.slane %v1102_v49, %v227_v23  ;;  %v1111_v52 = vrot.slane %v1102_v49, %v223_v62  ;;  %v1119_v53 = vrot.slane %v1102_v49, %v231_v26  ;;  %v2049_v62 = vld [vmem:[#allocation9 + $0x218] sm:$0xff] }
 0x259   :  { %v3377_v26 = vpack.c.bf16 %v2049_v62, %v2048_v11 }
 0x25a   :  { %3324 = vmatpush3.bf16.msra.mxu0 %v3323_v2 }
 0x25b   :  { %3356 = vmatpush3.bf16.msra.mxu1 %v3355_v3  ;;  %3326 = vmatprep.subr.bf16.mxu0 %v3325_v4  ;;  %v2046_v3 = vld [vmem:[#allocation9 + $0x200] sm:$0xff]  ;;  %v2047_v4 = vld [vmem:[#allocation9 + $0x208] sm:$0xff] }
 0x25c   :  { %3358 = vmatprep.subr.bf16.mxu1 %v3357_v57  ;;  %v3374_v57 = vpack.c.bf16 %v2047_v4, %v2046_v3 }
 0x25e   :  { %3328 = vmatpush3.bf16.msra.mxu0 %v3327_v14  ;;  %v2052_v14 = vld [vmem:[#allocation9 + $0x230] sm:$0xff] }
 0x25f   :  { %3360 = vmatpush3.bf16.msra.mxu1 %v3359_v16  ;;  %3330 = vmatprep.subr.bf16.mxu0 %v3329_v17  ;;  %v2053_v16 = vld [vmem:[#allocation9 + $0x238] sm:$0xff] }
 0x260   :  { %3362 = vmatprep.subr.bf16.mxu1 %v3361_v18  ;;  %v3383_v17 = vpack.c.bf16 %v2053_v16, %v2052_v14  ;;  %v2057_v18 = vld [vmem:[#allocation9 + $0x258] sm:$0xff] }
 0x262   :  { %3332 = vmatpush3.bf16.msra.mxu0 %v3331_v6  ;;  %v2061_v6 = vld [vmem:[#allocation9 + $0x278] sm:$0xff] }
 0x263   :  { %3364 = vmatpush3.bf16.msra.mxu1 %v3363_v29  ;;  %3334 = vmatprep.subr.bf16.mxu0 %v3333_v31  ;;  %v1123_v31 = vrot.slane %v1102_v49, %v235_v19  ;;  %v3395_v32 = vpack.c.bf16 %v2061_v6, %v2060_v27 }
 0x264   :  { %3366 = vmatprep.subr.bf16.mxu1 %v3365_v34 }
 0x266   :  { %3336 = vmatpush3.bf16.msra.mxu0 %v3335_v41 }
 0x267   :  { %3368 = vmatpush3.bf16.msra.mxu1 %v3367_v42  ;;  %3338 = vmatprep.subr.bf16.mxu0 %v3337_v58 }
 0x268   :  { %3370 = vmatprep.subr.bf16.mxu1 %v3369_v46 }
 0x26a   :  { %3340 = vmatpush3.bf16.msra.mxu0 %v3339_v48 }
 0x26b   :  { %3372 = vmatpush3.bf16.msra.mxu1 %v3371_v61  ;;  %3373 = vmatprep.subr.bf16.mxu0 %v3584_v1 }
 0x2e0   :  { %v1408_v54 = vpop.f32.mrb[4].mxu0  ;;  %v1692_v55 = vpop.f32.mrb[4].mxu1 }
 0x2e1   :  { %v3397_v56 = vadd.f32 %v1408_v54, %v1107_v50  ;;  %v3399_v63 = vadd.f32 %v1692_v55, %v1115_v51  ;;  %v1410_v36 = vpop.f32.mrb[5].mxu0  ;;  %v1694_v2 = vpop.f32.mrb[5].mxu1 }
 0x2e2   :  { %v3398_v5 = vadd.f32 %v1410_v36, %v1111_v52  ;;  %v3400_v7 = vadd.f32 %v1694_v2, %v1119_v53 }
 0x2e3   :  { %v1977_v23 = vmax.f32 %v3397_v56, 0.0  ;;  %v1979_v10 = vmax.f32 %v3399_v63, 0.0 }
 0x2e4   :  { %v1978_v60 = vmax.f32 %v3398_v5, 0.0  ;;  %v1980_v8 = vmax.f32 %v3400_v7, 0.0 }
 0x2e6   :  { %2133 = vmatprep.mubr.f32.mxu0 %v1978_v60  ;;  %2203 = vmatprep.mubr.f32.mxu1 %v1980_v8 }
 0x2e7   :  { %2134 = vmatmul.mubr.f32.vlgmr.msra.gmra.mrb[10].mxu0 %v1977_v23  ;;  %2204 = vmatmul.mubr.f32.vlgmr.msra.gmra.mrb[10].mxu1 %v1979_v10 }
 0x2e8   :  { %3375 = vmatpush3.bf16.msra.mxu0 %v3374_v57  ;;  %2618 = vmatprep.mubr.msk.f32.mxu0 %vm3585_vm0, %v3583_v0  ;;  %v2056_v0 = vld [vmem:[#allocation9 + $0x250] sm:$0xff] }
 0x2e9   :  { %3376 = vmatprep.subr.bf16.mxu0 %v3584_v1  ;;  %v3389_v21 = vpack.c.bf16 %v2057_v18, %v2056_v0 }
 0x2ec   :  { %3378 = vmatpush3.bf16.msra.mxu0 %v3377_v26 }
 0x2ed   :  { %3379 = vmatprep.subr.bf16.mxu0 %v3584_v1 }
 0x2f0   :  { %3381 = vmatpush3.bf16.msra.mxu0 %v3380_v13 }
 0x2f1   :  { %3382 = vmatprep.subr.bf16.mxu0 %v3584_v1 }
 0x2f4   :  { %3384 = vmatpush3.bf16.msra.mxu0 %v3383_v17 }
 0x2f5   :  { %3385 = vmatprep.subr.bf16.mxu0 %v3584_v1 }
 0x2f8   :  { %3387 = vmatpush3.bf16.msra.mxu0 %v3386_v28 }
 0x2f9   :  { %3388 = vmatprep.subr.bf16.mxu0 %v3584_v1 }
 0x2fc   :  { %3390 = vmatpush3.bf16.msra.mxu0 %v3389_v21 }
 0x2fd   :  { %3391 = vmatprep.subr.bf16.mxu0 %v3584_v1 }
 0x300   :  { %v2339_v29 = vpop.f32.mrb[6].mxu0  ;;  %3393 = vmatpush3.bf16.msra.mxu0 %v3392_v25 }
 0x301   :  { %v2374_v33 = vpop.f32.mrb[6].mxu1  ;;  %v2340_v34 = vpop.f32.mrb[7].mxu0  ;;  %3394 = vmatprep.subr.bf16.mxu0 %v3584_v1 }
 0x302   :  { %v2341_v35 = vadd.f32 %v2340_v34, %v2339_v29  ;;  %v2375_v37 = vpop.f32.mrb[7].mxu1 }
 0x303   :  { %v2376_v39 = vadd.f32 %v2375_v37, %v2374_v33 }
 0x304   :  { %v1764_v40 = vadd.f32 %v2341_v35, %v1123_v31  ;;  %3396 = vmatpush3.bf16.msra.mxu0 %v3395_v32 }
 0x306   :  { %v1834_v30 = vadd.f32 %v2376_v39, %v1764_v40 }
 0x320   :  { %v2409_v41 = vpop.f32.mrb[8].mxu0 }
 0x321   :  { %v1973_v15 = vpop.f32.mrb[8].mxu1  ;;  %v2410_v42 = vpop.f32.mrb[9].mxu0 }
 0x322   :  { %v2411_v58 = vadd.f32 %v2410_v42, %v2409_v41  ;;  %v2585_v44 = vpop.f32.mrb[9].mxu1 }
 0x324   :  { %v1904_v45 = vadd.f32 %v2411_v58, %v1834_v30 }
 0x326   :  { %v1974_v59 = vadd.f32 %v1973_v15, %v1904_v45 }
 0x328   :  { %v1981_v19 = vmax.f32 %v1974_v59, 0.0 }
 0x32a   :  { %2619 = vmatmul.mubr.f32.vlgmr.msra.gmra.mrb[12].mxu0 %v1981_v19 }
 0x3ba   :  { %v2461_v46 = vpop.f32.mrb[10].mxu0  ;;  %v2496_v47 = vpop.f32.mrb[10].mxu1 }
 0x3bb   :  { %v2462_v48 = vpop.f32.mrb[11].mxu0  ;;  %v2497_v1 = vpop.f32.mrb[11].mxu1 }
 0x3bc   :  { %v2463_v61 = vadd.f32 %v2462_v48, %v2461_v46  ;;  %v2498_v49 = vadd.f32 %v2497_v1, %v2496_v47 }
 0x3be   :  { %v2136_v50 = vadd.f32 %v2463_v61, %v2289_v9 }
 0x3c0   :  { %v2206_v51 = vadd.f32 %v2498_v49, %v2136_v50 }
 0x3fd   :  { %v2275_v52 = vpop.f32.mrb[12].mxu0 }
 0x3fe   :  { %v2276_v53 = vadd.f32 %v2275_v52, %v2206_v51  ;;  %v2620_v54 = vpop.f32.mrb[13].mxu0 }
 0x400   :  { %3428 = vtanh.f32 %v2276_v53 }
 0x40a   :  { %v3429_v55 = vpop.eup %3428 }
 0x40b   :  { %2280 = vst [vmem:[%s3839_s7] sm:$0xff] %v3429_v55 }
 0x40c   :  { %2285 = vsyncpa [#allocation3], 1 }
 0x40d   :  { %2286 = vsyncpa [#allocation5], 1 }
 0x40e   :  { %2287 = vsyncpa [#allocation8], 1 }
 0x40f   :  { %2288 = vsyncpa [#allocation11], 1 }

</bundles_post_ra>
